<compile_context>
chip_gen: v6e
topology: v6e:2x2x1
jax: 0.10.0
libtpu: 0.0.40
codegen_flags: <defaults>
</compile_context>

<pallas_src>
from functools import partial

import jax
import jax.numpy as jnp
from jax.experimental import pallas as pl
from jax.experimental.pallas import tpu as pltpu


def _lsa_kernel(x_ref, w_ref, b_ref, o_ref, *, num_heads, head_c, n_win, n_win_pad,
                windows_per_block, fuse_qkv, compute_dtype):
    """One block of `windows_per_block` local windows per grid step.

    x_ref: (windows_per_block * n_win_pad, C)  window-contiguous tokens (compute_dtype)
    w_ref: fused -> (C, 3C); split -> (3, C, C)   qkv weights, softmax scale folded into q
    b_ref: fused -> (1, 3C); split -> (3, 1, C)   qkv bias (f32, scale folded into q)
    o_ref: (windows_per_block * n_win_pad, C)  output, channels ordered (head, head_c)
    """
    C = num_heads * head_c
    T = windows_per_block * n_win_pad
    x = x_ref[...]                                                    # (T, C)

    # ---- QKV projection: big-M MXU dots, f32 accumulation ----------------------------
    if fuse_qkv:
        qkv = jnp.dot(x, w_ref[...], preferred_element_type=jnp.float32) + b_ref[...]
        q2, k2, v2 = qkv[:, 0:C], qkv[:, C:2 * C], qkv[:, 2 * C:3 * C]   # lane-aligned
    else:
        q2 = jnp.dot(x, w_ref[0], preferred_element_type=jnp.float32) + b_ref[0]
        k2 = jnp.dot(x, w_ref[1], preferred_element_type=jnp.float32) + b_ref[1]
        v2 = jnp.dot(x, w_ref[2], preferred_element_type=jnp.float32) + b_ref[2]

    # ---- head-batched layout: one relayout per tensor (not per-head lane slices) ------
    def to_heads(y):
        y = y.astype(compute_dtype).reshape(windows_per_block, n_win_pad, num_heads, head_c)
        y = jnp.transpose(y, (0, 2, 1, 3))                            # (W, H, n, d)
        return y.reshape(windows_per_block * num_heads, n_win_pad, head_c)

    q3, k3, v3 = to_heads(q2), to_heads(k2), to_heads(v2)

    # ---- attention over the combined (window, head) batch; softmax in f32 -------------
    s = jnp.einsum('bqd,bkd->bqk', q3, k3, preferred_element_type=jnp.float32)
    if n_win_pad != n_win:
        # mask padded keys (window padded from n_win to n_win_pad tokens)
        kidx = jax.lax.broadcasted_iota(jnp.int32, (1, 1, n_win_pad), 2)
        s = jnp.where(kidx >= n_win, jnp.float32(-1e30), s)
    s = s - jnp.max(s, axis=-1, keepdims=True)
    p = jnp.exp(s)
    p = p * pl.reciprocal(jnp.sum(p, axis=-1, keepdims=True), approx=True)

    o3 = jnp.einsum('bqk,bkd->bqd', p.astype(compute_dtype), v3,
                    preferred_element_type=jnp.float32)               # (W*H, n, d)

    # ---- assemble full (T, C) block and store once (lane-dense) -----------------------
    o = o3.reshape(windows_per_block, num_heads, n_win_pad, head_c)
    o = jnp.transpose(o, (0, 2, 1, 3)).reshape(T, C)
    o_ref[...] = o.astype(o_ref.dtype)


def _vmem_limit_bytes():
    """Scoped-VMEM limit: well above the 16/32 MiB defaults, headroom below physical."""
    try:
        cap = int(pltpu.get_tpu_info().vmem_capacity_bytes)           # 128 MiB v5e/v6e, 64 MiB v7x
    except Exception:
        cap = 64 << 20                                                # conservative fallback
    return int(min(cap * 3 // 4, 96 << 20))


def _pick_windows_per_block(total_windows, n_win_pad, C, num_heads, budget_bytes):
    """Biggest block that fits the f32 working-set budget, preferring >=4 grid steps
    (pipelining + both v7x TensorCores), then >=2, then whatever is left."""
    # rough per-token f32 bytes: qkv result + head-layout q/k/v + outputs + scores/probs
    bytes_per_token = 4 * (12 * C + 2 * num_heads * n_win_pad)
    max_tokens = max(n_win_pad, min(8192, budget_bytes // bytes_per_token))
    divisors = [w for w in range(1, total_windows + 1) if total_windows % w == 0]
    legal = [w for w in divisors if w * n_win_pad <= max_tokens] or [1]
    for min_steps in (4, 2, 1):
        cand = [w for w in legal if total_windows // w >= min_steps]
        if cand:
            return max(cand)
    return 1


def lsa_forward(x, H, W, params, window_size, num_heads, compute_dtype=jnp.bfloat16):
    B, N, C = x.shape
    assert N == H * W
    assert C % num_heads == 0
    if isinstance(window_size, int):
        window_size = (window_size, window_size)
    ws_h, ws_w = window_size
    pad_w = (ws_w - W % ws_w) % ws_w
    pad_h = (ws_h - H % ws_h) % ws_h
    if pad_w or pad_h:
        # TODO(synk): nonzero image-padding branch of the reference (F.pad on a BHWC view)
        # is not implemented; only H, W divisible by window_size is supported.
        raise NotImplementedError("H, W must be divisible by window_size")

    h_patch, w_patch = H // ws_h, W // ws_w
    n_win = ws_h * ws_w
    n_win_pad = (n_win + 7) // 8 * 8          # keep second-minor dims (8,*)-aligned
    head_c = C // num_heads
    scale = head_c ** (-0.5)
    total_windows = B * h_patch * w_patch
    total_tokens = total_windows * n_win_pad

    # ---- window partition (XLA glue) -> window-contiguous (tokens, C) slab ------------
    xw = x.reshape(B, h_patch, ws_h, w_patch, ws_w, C)
    xw = xw.transpose(0, 1, 3, 2, 4, 5).reshape(total_windows, n_win, C)
    if n_win_pad != n_win:
        xw = jnp.pad(xw, ((0, 0), (0, n_win_pad - n_win), (0, 0)))
    xw = xw.reshape(total_tokens, C).astype(compute_dtype)

    # ---- weight repack (scale folded into q); bf16 weights, f32 bias ------------------
    w_qkv = params["w_qkv"]                    # (C, 3C), y = x @ W + b
    b_qkv = params["b_qkv"]                    # (3C,)
    fuse_qkv = (C % 128 == 0) and (C < 256)    # one N=3C dot fills the 256-wide MXU
    if fuse_qkv:
        w_in = jnp.concatenate([w_qkv[:, 0:C] * scale, w_qkv[:, C:]], axis=1)
        w_in = w_in.astype(compute_dtype)
        b_in = jnp.concatenate([b_qkv[0:C] * scale, b_qkv[C:]]).reshape(1, 3 * C)
        b_in = b_in.astype(jnp.float32)
        w_spec = pl.BlockSpec((C, 3 * C), lambda i: (0, 0))
        b_spec = pl.BlockSpec((1, 3 * C), lambda i: (0, 0))
    else:
        w_in = jnp.stack([w_qkv[:, 0:C] * scale, w_qkv[:, C:2 * C], w_qkv[:, 2 * C:3 * C]],
                         axis=0).astype(compute_dtype)
        b_in = jnp.stack([b_qkv[0:C] * scale, b_qkv[C:2 * C], b_qkv[2 * C:3 * C]],
                         axis=0).reshape(3, 1, C).astype(jnp.float32)
        w_spec = pl.BlockSpec((3, C, C), lambda i: (0, 0, 0))
        b_spec = pl.BlockSpec((3, 1, C), lambda i: (0, 0, 0))

    vmem_limit = _vmem_limit_bytes()
    wpb = _pick_windows_per_block(total_windows, n_win_pad, C, num_heads, vmem_limit // 3)
    tok_blk = wpb * n_win_pad
    grid = (total_windows // wpb,)

    kernel = partial(_lsa_kernel, num_heads=num_heads, head_c=head_c, n_win=n_win,
                     n_win_pad=n_win_pad, windows_per_block=wpb, fuse_qkv=fuse_qkv,
                     compute_dtype=compute_dtype)
    out2d = pl.pallas_call(
        kernel,
        out_shape=jax.ShapeDtypeStruct((total_tokens, C), x.dtype),
        grid_spec=pltpu.PrefetchScalarGridSpec(
            num_scalar_prefetch=0,
            grid=grid,
            in_specs=[
                pl.BlockSpec((tok_blk, C), lambda i: (i, 0)),
                w_spec,                                     # constant index map: resident
                b_spec,
            ],
            out_specs=pl.BlockSpec((tok_blk, C), lambda i: (i, 0)),
        ),
        compiler_params=pltpu.CompilerParams(
            dimension_semantics=("parallel",),
            vmem_limit_bytes=vmem_limit,
        ),
    )(xw, w_in, b_in)

    # ---- window merge (XLA glue): drop window padding, back to (B, H*W, C) ------------
    out = out2d.reshape(total_windows, n_win_pad, C)[:, :n_win, :]
    out = out.reshape(B, h_patch, w_patch, ws_h, ws_w, C)
    out = out.transpose(0, 1, 3, 2, 4, 5).reshape(B, H * W, C)
    # NOTE: reference forward never applies self.proj; dropouts (p=0) are identity.
    return out


def lsa_reference(x, H, W, params, window_size, num_heads):
    """Pure-JAX f32 mirror of the PyTorch forward (zero-padding case) for verification."""
    B, N, C = x.shape
    ws_h, ws_w = window_size
    head_c = C // num_heads
    scale = head_c ** (-0.5)
    h_patch, w_patch = H // ws_h, W // ws_w
    tp = h_patch * w_patch
    xw = x.reshape(B, h_patch, ws_h, w_patch, ws_w, C).transpose(0, 1, 3, 2, 4, 5)
    qkv = xw @ params["w_qkv"] + params["b_qkv"]
    qkv = qkv.reshape(B, tp, ws_h * ws_w, 3, num_heads, head_c).transpose(3, 0, 1, 4, 2, 5)
    q, k, v = qkv[0] * scale, qkv[1], qkv[2]
    attn = jax.nn.softmax(q @ jnp.swapaxes(k, -2, -1), axis=-1)
    o = attn @ v                                               # (B, tp, nh, n_win, hc)
    o = o.reshape(B, h_patch, w_patch, num_heads, ws_h, ws_w, head_c)
    o = o.transpose(0, 1, 4, 2, 5, 3, 6).reshape(B, H * W, C)
    return o


if __name__ == "__main__":
    key = jax.random.PRNGKey(0)

    configs = [
        # (B,  C,  H,  W, num_heads, window_size)
        (2, 32, 8, 8, 4, (4, 4)),       # split-QKV path, n_win already a multiple of 8
        (2, 128, 8, 8, 4, (4, 4)),      # fused-QKV path (C == 128)
        (2, 64, 14, 14, 8, (7, 7)),     # Twins-style 7x7 windows -> padded / masked path
    ]
    for (B, C, H, W, num_heads, window_size) in configs:
        key, k1, k2, k3 = jax.random.split(key, 4)
        x = jax.random.normal(k1, (B, H * W, C), dtype=jnp.float32)
        params = {
            "w_qkv": jax.random.normal(k2, (C, 3 * C), dtype=jnp.float32) / (C ** 0.5),
            "b_qkv": 0.02 * jax.random.normal(k3, (3 * C,), dtype=jnp.float32),
        }

        out = jax.block_until_ready(lsa_forward(x, H, W, params, window_size, num_heads))
        ref = lsa_reference(x, H, W, params, window_size, num_heads)
        assert out.shape == (B, H * W, C), out.shape

        err = jnp.abs(out - ref)
        max_err = float(jnp.max(err))
        mean_err = float(jnp.mean(err))
        # Default path runs the MXU in bf16 (per perf review); semantic bugs would give
        # O(1) errors, so these bounds still catch them while tolerating bf16 rounding.
        assert max_err < 2e-1 and mean_err < 3e-2, (max_err, mean_err)

    print("KERNEL_OK")
</pallas_src>

<mosaic_0001>
module attributes {stable_mosaic.version = 11 : i64} {
  func.func @_lsa_kernel(%arg0: i32, %arg1: memref<32x32xbf16, #tpu.memory_space<vmem>>, %arg2: memref<3x32x32xbf16, #tpu.memory_space<vmem>>, %arg3: memref<3x1x32xf32, #tpu.memory_space<vmem>>, %arg4: memref<32x32xf32, #tpu.memory_space<vmem>>) attributes {dimension_semantics = [#tpu.dimension_semantics<parallel>], iteration_bounds = array<i64: 4>, scalar_prefetch = 0 : i64, scratch_operands = 0 : i64, tpu.core_type = #tpu.core_type<tc>, window_params = [{transform_indices = @transform_0, window_bounds = array<i64: 32, 32>}, {pipeline_mode = #tpu.pipeline_mode<synchronous>, transform_indices = @transform_1, window_bounds = array<i64: 3, 32, 32>}, {pipeline_mode = #tpu.pipeline_mode<synchronous>, transform_indices = @transform_2, window_bounds = array<i64: 3, 1, 32>}, {transform_indices = @transform_3, window_bounds = array<i64: 32, 32>}]} {
    %c0 = arith.constant 0 : index
    %c0_0 = arith.constant 0 : index
    %0 = vector.load %arg1[%c0, %c0_0] : memref<32x32xbf16, #tpu.memory_space<vmem>>, vector<32x32xbf16>
    %c0_1 = arith.constant 0 : index
    %c0_2 = arith.constant 0 : index
    %c0_3 = arith.constant 0 : index
    %1 = vector.load %arg2[%c0_1, %c0_2, %c0_3] : memref<3x32x32xbf16, #tpu.memory_space<vmem>>, vector<1x32x32xbf16>
    %2 = vector.shape_cast %1 : vector<1x32x32xbf16> to vector<32x32xbf16>
    %cst = arith.constant dense<0.000000e+00> : vector<32x32xf32>
    %3 = tpu.matmul %0, %2, %cst {dimension_numbers = #tpu.dot_dimension_numbers<[1], [0], [0], [1], [0, 0, 1, 1], [], []>} : vector<32x32xbf16>, vector<32x32xbf16>, vector<32x32xf32> -> vector<32x32xf32>
    %c0_4 = arith.constant 0 : index
    %c0_5 = arith.constant 0 : index
    %c0_6 = arith.constant 0 : index
    %4 = vector.load %arg3[%c0_4, %c0_5, %c0_6] : memref<3x1x32xf32, #tpu.memory_space<vmem>>, vector<1x1x32xf32>
    %5 = vector.shape_cast %4 : vector<1x1x32xf32> to vector<1x32xf32>
    %6 = vector.broadcast %5 : vector<1x32xf32> to vector<32x32xf32>
    %7 = arith.addf %3, %6 : vector<32x32xf32>
    %c1 = arith.constant 1 : index
    %c0_7 = arith.constant 0 : index
    %c0_8 = arith.constant 0 : index
    %8 = vector.load %arg2[%c1, %c0_7, %c0_8] : memref<3x32x32xbf16, #tpu.memory_space<vmem>>, vector<1x32x32xbf16>
    %9 = vector.shape_cast %8 : vector<1x32x32xbf16> to vector<32x32xbf16>
    %cst_9 = arith.constant dense<0.000000e+00> : vector<32x32xf32>
    %10 = tpu.matmul %0, %9, %cst_9 {dimension_numbers = #tpu.dot_dimension_numbers<[1], [0], [0], [1], [0, 0, 1, 1], [], []>} : vector<32x32xbf16>, vector<32x32xbf16>, vector<32x32xf32> -> vector<32x32xf32>
    %c1_10 = arith.constant 1 : index
    %c0_11 = arith.constant 0 : index
    %c0_12 = arith.constant 0 : index
    %11 = vector.load %arg3[%c1_10, %c0_11, %c0_12] : memref<3x1x32xf32, #tpu.memory_space<vmem>>, vector<1x1x32xf32>
    %12 = vector.shape_cast %11 : vector<1x1x32xf32> to vector<1x32xf32>
    %13 = vector.broadcast %12 : vector<1x32xf32> to vector<32x32xf32>
    %14 = arith.addf %10, %13 : vector<32x32xf32>
    %c2 = arith.constant 2 : index
    %c0_13 = arith.constant 0 : index
    %c0_14 = arith.constant 0 : index
    %15 = vector.load %arg2[%c2, %c0_13, %c0_14] : memref<3x32x32xbf16, #tpu.memory_space<vmem>>, vector<1x32x32xbf16>
    %16 = vector.shape_cast %15 : vector<1x32x32xbf16> to vector<32x32xbf16>
    %cst_15 = arith.constant dense<0.000000e+00> : vector<32x32xf32>
    %17 = tpu.matmul %0, %16, %cst_15 {dimension_numbers = #tpu.dot_dimension_numbers<[1], [0], [0], [1], [0, 0, 1, 1], [], []>} : vector<32x32xbf16>, vector<32x32xbf16>, vector<32x32xf32> -> vector<32x32xf32>
    %c2_16 = arith.constant 2 : index
    %c0_17 = arith.constant 0 : index
    %c0_18 = arith.constant 0 : index
    %18 = vector.load %arg3[%c2_16, %c0_17, %c0_18] : memref<3x1x32xf32, #tpu.memory_space<vmem>>, vector<1x1x32xf32>
    %19 = vector.shape_cast %18 : vector<1x1x32xf32> to vector<1x32xf32>
    %20 = vector.broadcast %19 : vector<1x32xf32> to vector<32x32xf32>
    %21 = arith.addf %17, %20 : vector<32x32xf32>
    %22 = arith.truncf %7 : vector<32x32xf32> to vector<32x32xbf16>
    %23 = vector.shape_cast %22 : vector<32x32xbf16> to vector<2x16x4x8xbf16>
    %24 = tpu.transpose %23, [0, 2, 1, 3] : vector<2x16x4x8xbf16> -> vector<2x4x16x8xbf16>
    %25 = vector.shape_cast %24 : vector<2x4x16x8xbf16> to vector<8x16x8xbf16>
    %26 = arith.truncf %14 : vector<32x32xf32> to vector<32x32xbf16>
    %27 = vector.shape_cast %26 : vector<32x32xbf16> to vector<2x16x4x8xbf16>
    %28 = tpu.transpose %27, [0, 2, 1, 3] : vector<2x16x4x8xbf16> -> vector<2x4x16x8xbf16>
    %29 = vector.shape_cast %28 : vector<2x4x16x8xbf16> to vector<8x16x8xbf16>
    %30 = arith.truncf %21 : vector<32x32xf32> to vector<32x32xbf16>
    %31 = vector.shape_cast %30 : vector<32x32xbf16> to vector<2x16x4x8xbf16>
    %32 = tpu.transpose %31, [0, 2, 1, 3] : vector<2x16x4x8xbf16> -> vector<2x4x16x8xbf16>
    %33 = vector.shape_cast %32 : vector<2x4x16x8xbf16> to vector<8x16x8xbf16>
    "tpu.trace_start"() <{level = 10 : i32, message = "bqd,bkd->bqk"}> : () -> ()
    %cst_19 = arith.constant dense<0.000000e+00> : vector<8x16x16xf32>
    %34 = tpu.matmul %25, %29, %cst_19 {dimension_numbers = #tpu.dot_dimension_numbers<[2], [2], [1], [1], [0, 0, 0, 1, 1, 1], [0], [0]>} : vector<8x16x8xbf16>, vector<8x16x8xbf16>, vector<8x16x16xf32> -> vector<8x16x16xf32>
    "tpu.trace_stop"() : () -> ()
    %cst_20 = arith.constant dense<0xFF800000> : vector<8x16xf32>
    %35 = vector.multi_reduction <maximumf>, %34, %cst_20 [2] : vector<8x16x16xf32> to vector<8x16xf32>
    %36 = vector.shape_cast %35 : vector<8x16xf32> to vector<8x16x1xf32>
    %37 = vector.broadcast %36 : vector<8x16x1xf32> to vector<8x16x16xf32>
    %38 = arith.subf %34, %37 : vector<8x16x16xf32>
    %39 = math.exp %38 : vector<8x16x16xf32>
    %cst_21 = arith.constant dense<0.000000e+00> : vector<8x16xf32>
    %40 = vector.multi_reduction <add>, %39, %cst_21 [2] : vector<8x16x16xf32> to vector<8x16xf32>
    %41 = vector.shape_cast %40 : vector<8x16xf32> to vector<8x16x1xf32>
    %42 = tpu.reciprocal %41 {approx = true} : vector<8x16x1xf32> -> vector<8x16x1xf32>
    %43 = vector.broadcast %42 : vector<8x16x1xf32> to vector<8x16x16xf32>
    %44 = arith.mulf %39, %43 : vector<8x16x16xf32>
    %45 = arith.truncf %44 : vector<8x16x16xf32> to vector<8x16x16xbf16>
    "tpu.trace_start"() <{level = 10 : i32, message = "bqk,bkd->bqd"}> : () -> ()
    %cst_22 = arith.constant dense<0.000000e+00> : vector<8x16x8xf32>
    %46 = tpu.matmul %45, %33, %cst_22 {dimension_numbers = #tpu.dot_dimension_numbers<[2], [1], [1], [2], [0, 0, 0, 1, 1, 2], [0], [0]>} : vector<8x16x16xbf16>, vector<8x16x8xbf16>, vector<8x16x8xf32> -> vector<8x16x8xf32>
    "tpu.trace_stop"() : () -> ()
    %47 = vector.shape_cast %46 : vector<8x16x8xf32> to vector<2x4x16x8xf32>
    %48 = tpu.transpose %47, [0, 2, 1, 3] : vector<2x4x16x8xf32> -> vector<2x16x4x8xf32>
    %49 = vector.shape_cast %48 : vector<2x16x4x8xf32> to vector<32x32xf32>
    %c0_23 = arith.constant 0 : index
    %c0_24 = arith.constant 0 : index
    %50 = vector.load %arg4[%c0_23, %c0_24] : memref<32x32xf32, #tpu.memory_space<vmem>>, vector<32x32xf32>
    tpu.vector_store %arg4[%c0_23, %c0_24], %49 {strides = array<i32>} : memref<32x32xf32, #tpu.memory_space<vmem>>, vector<32x32xf32>,
    return
  }
  func.func @transform_0(%arg0: i32) -> (i32, i32) {
    %c0_i32 = arith.constant 0 : i32
    %c0_i32_0 = arith.constant 0 : i32
    return %arg0, %c0_i32 : i32, i32
  }
  func.func @transform_1(%arg0: i32) -> (i32, i32, i32) {
    %c0_i32 = arith.constant 0 : i32
    %c0_i32_0 = arith.constant 0 : i32
    %c0_i32_1 = arith.constant 0 : i32
    %c0_i32_2 = arith.constant 0 : i32
    return %c0_i32, %c0_i32_0, %c0_i32_1 : i32, i32, i32
  }
  func.func @transform_2(%arg0: i32) -> (i32, i32, i32) {
    %c0_i32 = arith.constant 0 : i32
    %c0_i32_0 = arith.constant 0 : i32
    %c0_i32_1 = arith.constant 0 : i32
    %c0_i32_2 = arith.constant 0 : i32
    return %c0_i32, %c0_i32_0, %c0_i32_1 : i32, i32, i32
  }
  func.func @transform_3(%arg0: i32) -> (i32, i32) {
    %c0_i32 = arith.constant 0 : i32
    %c0_i32_0 = arith.constant 0 : i32
    return %arg0, %c0_i32 : i32, i32
  }
}

</mosaic_0001>

<bundles_post_ra>
// kernel: tpu_custom_call.1
= control target key start
LH: loop header
LB: loop body
LE: loop exit
PB: predicated region body
PF: predicated region fallthrough
CT: control target
= control target key end

     0   :  { %s3997_s12 = smov 0   ;;  %s4790_s0 = inlined_call_operand.vmem [shape: bf16[128,32], index: 0, kind: input, shape index: {}]   ;;  %s4791_s1 = inlined_call_operand.vmem [shape: bf16[3,32,32], index: 1, kind: input, shape index: {}]   ;;  %s4792_s2 = inlined_call_operand.vmem [shape: f32[3,1,32], index: 2, kind: input, shape index: {}]   ;;  %s4793_s3 = inlined_call_operand.vmem [shape: f32[128,32], index: 3, kind: output, shape index: {}]  }
   0x1 LB: > { %s3617_s13 = sadd.s32 4294967295, %s3964_s12   ;;  %p3621_p0 = scmp.ge.s32.totalorder %s3964_s12, 1  ;;  %s3964_s12 = sphi %s3997_s12, %s13_s12  }
   0x2   : > { %p138_p1 = scmp.lt.s32.totalorder %s3964_s12, 5 }
   0x4   : > { %p139_p2 = pnand %p3621_p0, %p138_p1 }
   0x5   : > { %s3622_s16 = sshll.u32 (!%p139_p2), %s3617_s13, 2  ;;  %s3966_s8 = smov (!%p139_p2), 104  }
   0x6   : > { %142 = sbr.rel (%p139_p2) target bundleno = 1331 (0x533), region = 32  ;;  %p163_p3 = scmp.lt.s32.totalorder (!%p139_p2), %s3622_s16, 15 }
   0x7   : > { %s3967_s9 = smov (!%p139_p2), 120   ;;  %s3968_s10 = smov (!%p139_p2), 112  }
   0x8   : > { %s3974_s14 = smov (!%p139_p2), 16   ;;  %s3975_s15 = smov (!%p139_p2), 8  }
   0x9   : > { %s3976_s17 = smov (!%p139_p2), 24  }
   0xb   : > { %v3886_v0 = vld [vmem:[%s4791_s1 + $0x18] sm:$0xff]   ;;  %v3887_v1 = vld [vmem:[%s4791_s1 + $0x8] sm:$0xff]   ;;  %v3888_v2 = vld [vmem:[%s4791_s1 + $0x10] sm:$0xff]   ;;  %s4795_s16 = smov (!%p163_p3, %s3622_s16), 15  ;;  %vm212_vm0 = vcmask 261120   ;;  %v3969_v30 = vmov 0.0   ;;  %v474_v44 = vlaneseq }
   0xc   : > { %3755 = vmatprep.subr.bf16.mxu1 %v3886_v0  ;;  %3747 = vmatprep.subr.bf16.mxu0 %v3887_v1  ;;  %v3889_v3 = vld [vmem:[%s4791_s1] sm:$0xff]   ;;  %s3623_s23 = sshll.u32 %s4795_s16, 2  ;;  %v3892_v4 = vld [vmem:[%s4791_s1 + $0x28] sm:$0xff]   ;;  %vm3970_vm1 = vmmov 0   ;;  %v3971_v42 = vmov 1983009808  }
   0xd   : > { %3756 = vmatpush3.bf16.msra.mxu1 %v3886_v0  ;;  %3748 = vmatpush3.bf16.msra.mxu0 %v3887_v1  ;;  %s166_s26 = scalar_lea.vmem %s4790_s0, %s3623_s23  ;;  %v3893_v7 = vld [vmem:[%s4791_s1 + $0x20] sm:$0xff]   ;;  %v472_v43 = vunpack.c.l.s4 %v3971_v42  ;;  %v475_v48 = vshrl.u32 %v474_v44, 7  ;;  %v3972_v50 = vmov 1934713408   ;;  %v3973_v55 = vmov 0   ;;  %s3625_s18 = sshll.u32 %s4795_s16, 3 }
   0xe   : > { %3757 = vmatprep.subr.bf16.mxu1 %v3888_v2  ;;  %3749 = vmatprep.subr.bf16.mxu0 %v3889_v3  ;;  %v3890_v5 = vld [vmem:[%s166_s26] sm:$0xff]   ;;  %v3891_v6 = vld [vmem:[%s166_s26 + $0x8] sm:$0xff]   ;;  %v503_v51 = vunpack.c.l.s4 %v3972_v50  ;;  %v4083_v56 = vpack.i.b16 %v3973_v55, %v3973_v55  ;;  %vm2038_vm2 = vcmask 64512   ;;  %vm2415_vm3 = vcmask 130048   ;;  %s172_s21 = scalar_lea.vmem %s4793_s3, %s3625_s18 }
   0xf   : > { %3759 = vmatprep.mubr.msk.bf16.mxu1 %vm212_vm0, %v3890_v5  ;;  %3751 = vmatprep.mubr.msk.bf16.mxu0 %vm212_vm0, %v3890_v5  ;;  %v3638_v14 = vld [vmem:[%s4792_s2 + $0x1] ss:$0 sm:$0xff]  ;;  %v3626_v15 = vld [vmem:[%s4792_s2] ss:$0 sm:$0xff]  ;;  %v3648_v32 = vld [vmem:[%s4792_s2 + $0x2] ss:$0 sm:$0xff]  ;;  %v473_v47 = vunpack.c.0.s8 %v472_v43 }
  0x10   : > { %v504_v62 = vunpack.c.0.s8 %v503_v51  ;;  %vm3552_vm4 = vcmask 195584  }
  0x11   : > { %3758 = vmatpush3.bf16.msra.mxu1 %v3888_v2  ;;  %3750 = vmatpush3.bf16.msra.mxu0 %v3889_v3  ;;  %v4085_v57 = vsub.s32 %v473_v47, %v475_v48 }
  0x12   : > { %3763 = vmatprep.subr.bf16.mxu0 %v3892_v4  ;;  %3771 = vmatprep.subr.bf16.mxu1 %v3969_v30 }
  0x14   : > { %3760 = vmatmul.mubr.msk.bf16.vlgmr.msra.gmra.mxu1 %vm212_vm0, %v3891_v6  ;;  %3752 = vmatmul.mubr.msk.bf16.vlgmr.msra.gmra.mxu0 %vm212_vm0, %v3891_v6 }
  0x15   : > { %3764 = vmatpush3.bf16.msra.mxu0 %v3892_v4  ;;  %3767 = vmatprep.mubr.msk.bf16.mxu0 %vm212_vm0, %v3890_v5 }
  0x16   : > { %3765 = vmatprep.subr.bf16.mxu0 %v3893_v7  ;;  %3773 = vmatprep.mubr.msk.bf16.mxu1 %vm3970_vm1, %v3969_v30 }
  0x19   : > { %3766 = vmatpush3.bf16.msra.mxu0 %v3893_v7 }
  0x1a   : > { %3777 = vmatprep.subr.bf16.mxu0 %v3969_v30 }
  0x1c   : > { %3768 = vmatmul.mubr.msk.bf16.vlgmr.msra.gmra.mxu0 %vm212_vm0, %v3891_v6 }
  0x1d   : > { %3779 = vmatprep.mubr.msk.bf16.mxu0 %vm3970_vm1, %v3969_v30 }
  0xd4   : > { %v3761_v8 = vpop.f32.mrf.mxu1  ;;  %v3753_v9 = vpop.f32.mrf.mxu0 }
  0xd5   : > { %v336_v25 = vadd.f32 %v3761_v8, %v3638_v14  ;;  %v262_v26 = vadd.f32 %v3753_v9, %v3626_v15  ;;  %v4093_v8 = vsub.s32 %v504_v62, %v475_v48 }
  0xd6   : > { %v327_v10 = vpop.f32.mrf.mxu1  ;;  %v253_v11 = vpop.f32.mrf.mxu0 }
  0xd7   : > { %v328_v17 = vadd.f32 %v3638_v14, %v327_v10  ;;  %v254_v20 = vadd.f32 %v3626_v15, %v253_v11 }
  0xd8   : > { %v3762_v12 = vpop.f32.mrf.mxu1  ;;  %v3754_v13 = vpop.f32.mrf.mxu0 }
  0xd9   : > { %v339_v24 = vadd.f32 %v3762_v12, %v3638_v14  ;;  %v265_v28 = vadd.f32 %v3754_v13, %v3626_v15 }
  0xda   : > { %v330_v16 = vpop.f32.mrf.mxu1  ;;  %v256_v19 = vpop.f32.mrf.mxu0 }
  0xdb   : > { %v331_v18 = vadd.f32 %v3638_v14, %v330_v16  ;;  %v257_v22 = vadd.f32 %v3626_v15, %v256_v19  ;;  %v4052_v27 = vpack.c.bf16 %v339_v24, %v336_v25  ;;  %v4058_v29 = vpack.c.bf16 %v265_v28, %v262_v26 }
  0xdc   : > { %v3769_v31 = vpop.f32.mrf.mxu0 }
  0xdd   : > { %v958_v21 = vpack.c.bf16 %v331_v18, %v328_v17  ;;  %v4043_v23 = vpack.c.bf16 %v257_v22, %v254_v20  ;;  %v410_v33 = vadd.f32 %v3769_v31, %v3648_v32  ;;  %v994_v15 = vshrl.u32 %v4052_v27, 16 }
  0xde   : > { %v401_v34 = vpop.f32.mrf.mxu0 }
  0xdf   : > { %970 = vrot.lane.b32.xlu1 %v958_v21, %s3966_s8  ;;  %962 = vrot.lane.b32.xlu0 %v958_v21, %s3967_s9  ;;  %v402_v36 = vadd.f32 %v3648_v32, %v401_v34  ;;  %v978_v53 = vshrl.u32 %v958_v21, 16  ;;  %v436_v12 = vshrl.u32 %v4043_v23, 16 }
  0xe0   : > { %v3770_v35 = vpop.f32.mrf.mxu0 }
  0xe1   : > { %v413_v37 = vadd.f32 %v3770_v35, %v3648_v32 }
  0xe2   : > { %v404_v38 = vpop.f32.mrf.mxu0 }
  0xe3   : > { %966 = vrot.lane.b32.xlu0 %v958_v21, %s3968_s10  ;;  %420 = vrot.lane.b32.xlu1 %v4043_v23, %s3967_s9  ;;  %v4077_v39 = vpack.c.bf16 %v413_v37, %v410_v33  ;;  %v405_v40 = vadd.f32 %v3648_v32, %v404_v38 }
  0xe5   : > { %v4079_v41 = vpack.c.bf16 %v405_v40, %v402_v36 }
  0xe7   : > { %424 = vrot.lane.b32.xlu0 %v4043_v23, %s3968_s10  ;;  %428 = vrot.lane.b32.xlu1 %v4043_v23, %s3966_s8 }
  0xeb   : > { %964 = vrot.lane.b32.xlu0 %v4052_v27, %s3967_s9  ;;  %968 = vrot.lane.b32.xlu1 %v4052_v27, %s3968_s10 }
  0xef   : > { %972 = vrot.lane.b32.xlu0 %v4052_v27, %s3966_s8  ;;  %422 = vrot.lane.b32.xlu1 %v4058_v29, %s3967_s9 }
  0xf3   : > { %426 = vrot.lane.b32.xlu0 %v4058_v29, %s3968_s10  ;;  %430 = vrot.lane.b32.xlu1 %v4058_v29, %s3966_s8 }
  0xf7   : > { %1498 = vrot.lane.b32.xlu1 %v4079_v41, %s3967_s9 }
 0x151   : > { %v971_v45 = vpop.permute.xlu1 %970  ;;  %v963_v46 = vpop.permute.xlu0 %962 }
 0x152   : > { %v979_v49 = vshrl.u32 %v963_v46, 16  ;;  %v976_v58 = vpack.i.b16 %v963_v46, %v958_v21  ;;  %v987_v63 = vshrl.u32 %v971_v45, 16 }
 0x154   : > { %v980_v61 = vpack.i.b16 %v979_v49, %v978_v53  ;;  %v1006_v3 = vcombine.high %v976_v58, %v4083_v56  ;;  %v1013_v4 = vrot.slane %v976_v58, %v4085_v57 }
 0x155   : > { %v967_v52 = vpop.permute.xlu0 %966  ;;  %v421_v60 = vpop.permute.xlu1 %420 }
 0x156   : > { %v984_v54 = vpack.i.b16 %v971_v45, %v967_v52  ;;  %v986_v59 = vshrl.u32 %v967_v52, 16  ;;  %v434_v2 = vpack.i.b16 %v421_v60, %v4043_v23  ;;  %v437_v6 = vshrl.u32 %v421_v60, 16 }
 0x157   : > { %v1072_v7 = vcombine.high %v980_v61, %v4083_v56  ;;  %v1020_v16 = vrot.slane %v1006_v3, %v4085_v57  ;;  %v1079_v21 = vrot.slane %v980_v61, %v4085_v57  ;;  %v458_v23 = vshrl.u32 %v4058_v29, 16 }
 0x158   : > { %v1021_v0 = vcombine.high %v984_v54, %v4083_v56  ;;  %v1028_v1 = vrot.slane %v984_v54, %v4085_v57  ;;  %v988_v5 = vpack.i.b16 %v987_v63, %v986_v59  ;;  %v470_v14 = vcombine.high %v434_v2, %v4083_v56 }
 0x159   : > { %v425_v13 = vpop.permute.xlu0 %424  ;;  %v438_v19 = vpack.i.b16 %v437_v6, %v436_v12  ;;  %v429_v20 = vpop.permute.xlu1 %428  ;;  %v4104_v22 = vrot.slane %v1072_v7, %v4085_v57  ;;  %v477_v32 = vrot.slane %v434_v2, %v4085_v57 }
 0x15a   : > { %v1035_v9 = vrot.slane %v1021_v0, %v4085_v57  ;;  %v1036_v10 = vcombine.low %v1013_v4, %v1028_v1  ;;  %v1037_v11 = vcombine.high %v1013_v4, %v1028_v1  ;;  %v1087_v17 = vcombine.high %v988_v5, %v4083_v56 }
 0x15b   : > { %v1094_v18 = vrot.slane %v988_v5, %v4085_v57  ;;  %v444_v24 = vshrl.u32 %v425_v13, 16  ;;  %v484_v33 = vrot.slane %v470_v14, %v4085_v57  ;;  %v442_v34 = vpack.i.b16 %v429_v20, %v425_v13 }
 0x15c   : > { %v1044_v25 = vrot.slane %v1036_v10, %v4093_v8  ;;  %v1051_v26 = vrot.slane %v1037_v11, %v4093_v8  ;;  %v1052_v28 = vcombine.low %v1020_v16, %v1035_v9  ;;  %v1053_v31 = vcombine.high %v1020_v16, %v1035_v9 }
 0x15d   : > { %v445_v35 = vshrl.u32 %v429_v20, 16  ;;  %v1101_v36 = vrot.slane %v1087_v17, %v4085_v57  ;;  %v1102_v37 = vcombine.low %v1079_v21, %v1094_v18  ;;  %v1103_v38 = vcombine.high %v1079_v21, %v1094_v18  ;;  %v965_v42 = vpop.permute.xlu0 %964  ;;  %v969_v16 = vpop.permute.xlu1 %968 }
 0x15e   : > { %v536_v40 = vcombine.high %v438_v19, %v4083_v56  ;;  %v543_v43 = vrot.slane %v438_v19, %v4085_v57  ;;  %v485_v45 = vcombine.high %v442_v34, %v4083_v56  ;;  %v492_v46 = vrot.slane %v442_v34, %v4085_v57 }
 0x15f   : > { %v446_v44 = vpack.i.b16 %v445_v35, %v444_v24  ;;  %v4117_v47 = vrot.slane %v1052_v28, %v4093_v8  ;;  %v4120_v48 = vrot.slane %v1053_v31, %v4093_v8  ;;  %v1270_v49 = vcombine.low %v1044_v25, %v1051_v26 }
 0x160   : > { %v3661_v50 = vcombine.high %v1044_v25, %v1051_v26  ;;  %v499_v51 = vrot.slane %v485_v45, %v4085_v57  ;;  %v500_v52 = vcombine.low %v477_v32, %v492_v46  ;;  %v501_v53 = vcombine.high %v477_v32, %v492_v46 }
 0x161   : > { %v551_v54 = vcombine.high %v446_v44, %v4083_v56  ;;  %v4125_v55 = vrot.slane %v1102_v37, %v4093_v8  ;;  %v4128_v58 = vrot.slane %v1103_v38, %v4093_v8  ;;  %v1118_v59 = vcombine.low %v4104_v22, %v1101_v36  ;;  %v973_v5 = vpop.permute.xlu0 %972 }
 0x162   : > { %v558_v60 = vrot.slane %v446_v44, %v4085_v57  ;;  %v550_v61 = vrot.slane %v536_v40, %v4085_v57  ;;  %v508_v62 = vrot.slane %v500_v52, %v4093_v8  ;;  %v515_v63 = vrot.slane %v501_v53, %v4093_v8 }
 0x163   : > { %v516_v0 = vcombine.low %v484_v33, %v499_v51  ;;  %v517_v1 = vcombine.high %v484_v33, %v499_v51  ;;  %v565_v2 = vrot.slane %v551_v54, %v4085_v57  ;;  %v1119_v6 = vcombine.high %v4104_v22, %v1101_v36 }
 0x164   : > { %v566_v3 = vcombine.low %v543_v43, %v558_v60  ;;  %v567_v4 = vcombine.high %v543_v43, %v558_v60  ;;  %v4138_v7 = vrot.slane %v1270_v49, %v4085_v57  ;;  %v4141_v9 = vrot.slane %v3661_v50, %v4085_v57 }
 0x165   : > { %v1286_v10 = vcombine.low %v4117_v47, %v4120_v48  ;;  %v582_v11 = vcombine.low %v550_v61, %v565_v2  ;;  %v583_v12 = vcombine.high %v550_v61, %v565_v2  ;;  %v992_v13 = vpack.i.b16 %v965_v42, %v4052_v27 }
 0x166   : > { %v995_v14 = vshrl.u32 %v965_v42, 16  ;;  %v734_v17 = vcombine.low %v508_v62, %v515_v63  ;;  %v3653_v18 = vcombine.high %v508_v62, %v515_v63  ;;  %v1000_v19 = vpack.i.b16 %v973_v5, %v969_v16 }
 0x167   : > { %v1003_v20 = vshrl.u32 %v973_v5, 16  ;;  %v524_v21 = vrot.slane %v516_v0, %v4093_v8  ;;  %v531_v22 = vrot.slane %v517_v1, %v4093_v8  ;;  %v574_v24 = vrot.slane %v566_v3, %v4093_v8 }
 0x168   : > { %v581_v25 = vrot.slane %v567_v4, %v4093_v8  ;;  %v3662_v26 = vcombine.high %v4117_v47, %v4120_v48  ;;  %v590_v28 = vrot.slane %v582_v11, %v4093_v8  ;;  %v597_v31 = vrot.slane %v583_v12, %v4093_v8 }
 0x169   : > { %v1002_v32 = vshrl.u32 %v969_v16, 16  ;;  %v4155_v33 = vrot.slane %v1118_v59, %v4093_v8  ;;  %v4158_v34 = vrot.slane %v1119_v6, %v4093_v8  ;;  %v996_v35 = vpack.i.b16 %v995_v14, %v994_v15  ;;  %v423_v15 = vpop.permute.xlu1 %422 }
 0x16a   : > { %v1138_v36 = vcombine.high %v992_v13, %v4083_v56  ;;  %v741_v37 = vrot.slane %v734_v17, %v4085_v57  ;;  %v749_v38 = vrot.slane %v3653_v18, %v4085_v57  ;;  %v1153_v42 = vcombine.high %v1000_v19, %v4083_v56  ;;  %v427_v17 = vpop.permute.xlu0 %426 }
 0x16b   : > { %v1004_v40 = vpack.i.b16 %v1003_v20, %v1002_v32  ;;  %v750_v43 = vcombine.low %v524_v21, %v531_v22  ;;  %v3654_v44 = vcombine.high %v524_v21, %v531_v22  ;;  %v784_v45 = vcombine.low %v574_v24, %v581_v25 }
 0x16c   : > { %v3655_v46 = vcombine.high %v574_v24, %v581_v25  ;;  %v1320_v49 = vcombine.low %v4125_v55, %v4128_v58  ;;  %v800_v50 = vcombine.low %v590_v28, %v597_v31  ;;  %v3656_v51 = vcombine.high %v590_v28, %v597_v31 }
 0x16d   : > { %v1160_v27 = vrot.slane %v1000_v19, %v4085_v57  ;;  %v3663_v52 = vcombine.high %v4125_v55, %v4128_v58  ;;  %v1336_v53 = vcombine.low %v4155_v33, %v4158_v34  ;;  %v1145_v54 = vrot.slane %v992_v13, %v4085_v57  ;;  %v431_v22 = vpop.permute.xlu1 %430 }
 0x16e   : > { %v1204_v59 = vcombine.high %v996_v35, %v4083_v56  ;;  %v766_v60 = vcombine.low %v741_v37, %v749_v38  ;;  %v1152_v61 = vrot.slane %v1138_v36, %v4085_v57  ;;  %v1167_v62 = vrot.slane %v1153_v42, %v4085_v57 }
 0x16f   : > { %v1219_v63 = vcombine.high %v1004_v40, %v4083_v56  ;;  %v4179_v0 = vrot.slane %v750_v43, %v4085_v57  ;;  %v4182_v1 = vrot.slane %v3654_v44, %v4085_v57  ;;  %v4185_v2 = vrot.slane %v784_v45, %v4085_v57 }
 0x170   : > { %v4188_v3 = vrot.slane %v3655_v46, %v4085_v57  ;;  %v4191_v4 = vrot.slane %v800_v50, %v4085_v57  ;;  %v4194_v5 = vrot.slane %v3656_v51, %v4085_v57  ;;  %v1168_v6 = vcombine.low %v1145_v54, %v1160_v27 }
 0x171   : > { %v1169_v11 = vcombine.high %v1145_v54, %v1160_v27  ;;  %v3664_v12 = vcombine.high %v4155_v33, %v4158_v34  ;;  %v1211_v13 = vrot.slane %v996_v35, %v4085_v57  ;;  %v1218_v14 = vrot.slane %v1204_v59, %v4085_v57 }
 0x172   : > { %v1226_v16 = vrot.slane %v1004_v40, %v4085_v57  ;;  %v4202_v18 = vrot.slane %v766_v60, %v4093_v8  ;;  %v1184_v19 = vcombine.low %v1152_v61, %v1167_v62  ;;  %v1233_v20 = vrot.slane %v1219_v63, %v4085_v57 }
 0x173   : > { %v456_v21 = vpack.i.b16 %v423_v15, %v4058_v29  ;;  %v774_v24 = vcombine.low %v4179_v0, %v4182_v1  ;;  %v816_v25 = vcombine.low %v4185_v2, %v4188_v3  ;;  %v1185_v28 = vcombine.high %v1152_v61, %v1167_v62 }
 0x174   : > { %v459_v31 = vshrl.u32 %v423_v15, 16  ;;  %v824_v32 = vcombine.low %v4191_v4, %v4194_v5  ;;  %v1176_v35 = vrot.slane %v1168_v6, %v4093_v8  ;;  %v1183_v36 = vrot.slane %v1169_v11, %v4093_v8 }
 0x175   : > { %v466_v37 = vshrl.u32 %v427_v17, 16  ;;  %v1234_v38 = vcombine.low %v1211_v13, %v1226_v16  ;;  %v1235_v40 = vcombine.high %v1211_v13, %v1226_v16  ;;  %v464_v42 = vpack.i.b16 %v431_v22, %v427_v17 }
 0x176   : > { %v467_v43 = vshrl.u32 %v431_v22, 16  ;;  %v4215_v44 = vrot.slane %v1184_v19, %v4093_v8  ;;  %v1250_v45 = vcombine.low %v1218_v14, %v1233_v20  ;;  %v1251_v46 = vcombine.high %v1218_v14, %v1233_v20 }
 0x177   : > { %v602_v50 = vcombine.high %v456_v21, %v4083_v56  ;;  %v4219_v51 = vrot.slane %v1185_v28, %v4093_v8  ;;  %v460_v27 = vpack.i.b16 %v459_v31, %v458_v23  ;;  %v617_v54 = vcombine.high %v464_v42, %v4083_v56 }
 0x178   : > { %v468_v15 = vpack.i.b16 %v467_v43, %v466_v37  ;;  %v1370_v59 = vcombine.low %v1176_v35, %v1183_v36  ;;  %v3665_v60 = vcombine.high %v1176_v35, %v1183_v36  ;;  %v1293_v61 = vrot.slane %v1286_v10, %v4085_v57 }
 0x179   : > { %v1301_v62 = vrot.slane %v3662_v26, %v4085_v57  ;;  %v4233_v63 = vrot.slane %v1234_v38, %v4093_v8  ;;  %v4236_v29 = vrot.slane %v1235_v40, %v4093_v8  ;;  %v624_v23 = vrot.slane %v464_v42, %v4085_v57 }
 0x17a   : > { %v631_v6 = vrot.slane %v617_v54, %v4085_v57  ;;  %v4241_v11 = vrot.slane %v1250_v45, %v4093_v8  ;;  %v616_v10 = vrot.slane %v602_v50, %v4085_v57  ;;  %v683_v13 = vcombine.high %v468_v15, %v4083_v56 }
 0x17b   : > { %v690_v47 = vrot.slane %v468_v15, %v4085_v57  ;;  %v4247_v48 = vrot.slane %v1251_v46, %v4093_v8  ;;  %v609_v26 = vrot.slane %v456_v21, %v4085_v57  ;;  %v668_v14 = vcombine.high %v460_v27, %v4083_v56 }
 0x17c   : > { %v675_v16 = vrot.slane %v460_v27, %v4085_v57  ;;  %v648_v17 = vcombine.low %v616_v10, %v631_v6  ;;  %v649_v19 = vcombine.high %v616_v10, %v631_v6  ;;  %v1302_v20 = vcombine.low %v4138_v7, %v4141_v9 }
 0x17d   : > { %v1310_v22 = vcombine.low %v1293_v61, %v1301_v62  ;;  %v632_v28 = vcombine.low %v609_v26, %v624_v23  ;;  %v633_v31 = vcombine.high %v609_v26, %v624_v23  ;;  %v1327_v35 = vrot.slane %v1320_v49, %v4085_v57 }
 0x17e   : > { %v1335_v21 = vrot.slane %v3663_v52, %v4085_v57  ;;  %v4263_v36 = vrot.slane %v1370_v59, %v4085_v57  ;;  %v697_v37 = vrot.slane %v683_v13, %v4085_v57  ;;  %v698_v38 = vcombine.low %v675_v16, %v690_v47 }
 0x17f   : > { %v699_v7 = vcombine.high %v675_v16, %v690_v47  ;;  %v4267_v9 = vrot.slane %v3665_v60, %v4085_v57  ;;  %v1386_v40 = vcombine.low %v4215_v44, %v4219_v51  ;;  %v1343_v49 = vrot.slane %v1336_v53, %v4085_v57 }
 0x180   : > { %v1351_v55 = vrot.slane %v3664_v12, %v4085_v57  ;;  %v682_v58 = vrot.slane %v668_v14, %v4085_v57  ;;  %v656_v52 = vrot.slane %v648_v17, %v4093_v8  ;;  %v663_v42 = vrot.slane %v649_v19, %v4093_v8 }
 0x181   : > { %v1317_v43 = vrot.slane %v1310_v22, %v4093_v8  ;;  %v4281_v45 = vrot.slane %v632_v28, %v4093_v8  ;;  %v4284_v46 = vrot.slane %v633_v31, %v4093_v8  ;;  %v1309_v33 = vrot.slane %v1302_v20, %v4093_v8 }
 0x182   : > { %v1352_v34 = vcombine.low %v1327_v35, %v1335_v21  ;;  %v706_v53 = vrot.slane %v698_v38, %v4093_v8  ;;  %v713_v12 = vrot.slane %v699_v7, %v4093_v8  ;;  %v714_v50 = vcombine.low %v682_v58, %v697_v37 }
 0x183   : > { %v715_v27 = vcombine.high %v682_v58, %v697_v37  ;;  %v3666_v15 = vcombine.high %v4215_v44, %v4219_v51  ;;  %v1420_v54 = vcombine.low %v4233_v63, %v4236_v29  ;;  %v3667_v59 = vcombine.high %v4233_v63, %v4236_v29 }
 0x184   : > { %v1360_v60 = vcombine.low %v1343_v49, %v1351_v55  ;;  %v1436_v61 = vcombine.low %v4241_v11, %v4247_v48  ;;  %v3668_v62 = vcombine.high %v4241_v11, %v4247_v48  ;;  %v850_v23 = vcombine.low %v656_v52, %v663_v42 }
 0x185   : > { %v1318_v6 = vcombine.low %v1309_v33, %v1317_v43  ;;  %v834_v10 = vcombine.low %v4281_v45, %v4284_v46  ;;  %v3657_v44 = vcombine.high %v4281_v45, %v4284_v46  ;;  %v1359_v51 = vrot.slane %v1352_v34, %v4093_v8 }
 0x186   : > { %v1367_v13 = vrot.slane %v1360_v60, %v4093_v8  ;;  %v722_v63 = vrot.slane %v714_v50, %v4093_v8  ;;  %v729_v29 = vrot.slane %v715_v27, %v4093_v8  ;;  %v3658_v47 = vcombine.high %v656_v52, %v663_v42 }
 0x187   : > { %v884_v26 = vcombine.low %v706_v53, %v713_v12  ;;  %v3659_v14 = vcombine.high %v706_v53, %v713_v12  ;;  %v781_v48 = vrot.slane %v774_v24, %v4093_v8  ;;  %v831_v16 = vrot.slane %v824_v32, %v4093_v8 }
 0x188   : > { %v1368_v11 = vcombine.low %v1359_v51, %v1367_v13  ;;  %v4316_v17 = vrot.slane %v850_v23, %v4085_v57  ;;  %v1369_v19 = vcombine.high %v1359_v51, %v1367_v13  ;;  %v1393_v20 = vrot.slane %v1386_v40, %v4085_v57 }
 0x189   : > { %v1401_v22 = vrot.slane %v3666_v15, %v4085_v57  ;;  %v1473_v31 = vshrl.u32 %v1318_v6, 16  ;;  %v823_v0 = vrot.slane %v816_v25, %v4093_v8  ;;  %v4325_v1 = vrot.slane %v3658_v47, %v4085_v57 }
 0x18a   : > { %v1472_v28 = vpack.i.b16 %v1368_v11, %v1318_v6  ;;  %v1474_v35 = vshrl.u32 %v1368_v11, 16  ;;  %v900_v4 = vcombine.low %v722_v63, %v729_v29  ;;  %v3660_v5 = vcombine.high %v722_v63, %v729_v29 }
 0x18b   : > { %v1319_v24 = vcombine.high %v1309_v33, %v1317_v43  ;;  %v782_v37 = vcombine.low %v4202_v18, %v781_v48  ;;  %v832_v38 = vcombine.low %v823_v0, %v831_v16  ;;  %v1480_v7 = vshrl.u32 %v1369_v19, 16 }
 0x18c   : > { %v2043_v32 = vsel %vm2038_vm2, %v1472_v28, 0  ;;  %v1475_v21 = vpack.i.b16 %v1474_v35, %v1473_v31  ;;  %v1402_v40 = vcombine.low %v4263_v36, %v4267_v9  ;;  %v1410_v49 = vcombine.low %v1393_v20, %v1401_v22 }
 0x18d   : > { %3772 = vmatpush3.bf16.xpose.msra.mxu1 %v2043_v32  ;;  %v1427_v2 = vrot.slane %v1420_v54, %v4085_v57  ;;  %v1435_v25 = vrot.slane %v3667_v59, %v4085_v57  ;;  %v1443_v55 = vrot.slane %v1436_v61, %v4085_v57  ;;  %v1451_v58 = vrot.slane %v3668_v62, %v4085_v57 }
 0x18e   : > { %v2090_v3 = vsel %vm2038_vm2, %v1475_v21, 0  ;;  %3783 = vmatprep.subr.bf16.mxu1 %v3969_v30  ;;  %v907_v52 = vrot.slane %v900_v4, %v4085_v57  ;;  %v915_v42 = vrot.slane %v3660_v5, %v4085_v57  ;;  %v1478_v43 = vpack.i.b16 %v1369_v19, %v1319_v24 }
 0x18f   : > { %3778 = vmatpush3.bf16.xpose.msra.mxu0 %v2090_v3  ;;  %v1479_v36 = vshrl.u32 %v1319_v24, 16  ;;  %v938_v9 = vshrl.u32 %v832_v38, 16  ;;  %v1417_v45 = vrot.slane %v1410_v49, %v4093_v8  ;;  %v1452_v46 = vcombine.low %v1427_v2, %v1435_v25 }
 0x190   : > { %3789 = vmatprep.subr.bf16.mxu0 %v3969_v30  ;;  %v1460_v33 = vcombine.low %v1443_v55, %v1451_v58  ;;  %v891_v34 = vrot.slane %v884_v26, %v4085_v57  ;;  %v899_v53 = vrot.slane %v3659_v14, %v4085_v57  ;;  %v936_v12 = vpack.i.b16 %v832_v38, %v782_v37 }
 0x191   : > { %v937_v50 = vshrl.u32 %v782_v37, 16  ;;  %v1481_v27 = vpack.i.b16 %v1480_v7, %v1479_v36  ;;  %v1409_v15 = vrot.slane %v1402_v40, %v4093_v8  ;;  %v1459_v54 = vrot.slane %v1452_v46, %v4093_v8 }
 0x192   : > { %v1467_v59 = vrot.slane %v1460_v33, %v4093_v8  ;;  %v841_v60 = vrot.slane %v834_v10, %v4085_v57  ;;  %v849_v61 = vrot.slane %v3657_v44, %v4085_v57  ;;  %v924_v62 = vcombine.low %v907_v52, %v915_v42 }
 0x193   : > { %v833_v23 = vcombine.high %v823_v0, %v831_v16  ;;  %v2137_v6 = vsel %vm2038_vm2, %v1478_v43, 0  ;;  %v939_v51 = vpack.i.b16 %v938_v9, %v937_v50  ;;  %v1418_v13 = vcombine.low %v1409_v15, %v1417_v45 }
 0x194   : > { %3774 = vmatmul.mubr.msk.bf16.vlgmr.msra.gmra.mxu1 %vm2038_vm2, %v936_v12  ;;  %v1468_v63 = vcombine.low %v1459_v54, %v1467_v59  ;;  %v783_v29 = vcombine.high %v4202_v18, %v781_v48  ;;  %v874_v10 = vcombine.low %v4316_v17, %v4325_v1  ;;  %v916_v47 = vcombine.low %v891_v34, %v899_v53 }
 0x195   : > { %3784 = vmatpush3.bf16.xpose.msra.mxu1 %v2137_v6  ;;  %3785 = vmatprep.mubr.msk.bf16.mxu1 %vm3970_vm1, %v3969_v30  ;;  %v2184_v44 = vsel %vm2038_vm2, %v1481_v27, 0  ;;  %v866_v14 = vcombine.low %v841_v60, %v849_v61  ;;  %v944_v16 = vshrl.u32 %v833_v23, 16  ;;  %v1485_v18 = vshrl.u32 %v1418_v13, 16 }
 0x196   : > { %3780 = vmatmul.mubr.msk.bf16.vlgmr.msra.gmra.mxu0 %vm2038_vm2, %v939_v51  ;;  %3795 = vmatprep.subr.bf16.mxu1 %v3969_v30  ;;  %v1486_v26 = vshrl.u32 %v1468_v63, 16  ;;  %v1484_v11 = vpack.i.b16 %v1468_v63, %v1418_v13  ;;  %v931_v48 = vrot.slane %v924_v62, %v4093_v8  ;;  %v942_v17 = vpack.i.b16 %v833_v23, %v783_v29 }
 0x197   : > { %3790 = vmatpush3.bf16.xpose.msra.mxu0 %v2184_v44  ;;  %3791 = vmatprep.mubr.msk.bf16.mxu0 %vm3970_vm1, %v3969_v30  ;;  %v943_v19 = vshrl.u32 %v783_v29, 16  ;;  %v881_v22 = vrot.slane %v874_v10, %v4093_v8  ;;  %v923_v28 = vrot.slane %v916_v47, %v4093_v8  ;;  %v1469_v31 = vcombine.high %v1459_v54, %v1467_v59 }
 0x198   : > { %3801 = vmatprep.subr.bf16.mxu0 %v3969_v30  ;;  %v1487_v20 = vpack.i.b16 %v1486_v26, %v1485_v18  ;;  %v873_v35 = vrot.slane %v866_v14, %v4093_v8  ;;  %v2231_v0 = vsel %vm2038_vm2, %v1484_v11, 0  ;;  %v1419_v5 = vcombine.high %v1409_v15, %v1417_v45 }
 0x199   : > { %v945_v1 = vpack.i.b16 %v944_v16, %v943_v19  ;;  %v932_v4 = vcombine.low %v923_v28, %v931_v48  ;;  %v1492_v21 = vshrl.u32 %v1469_v31, 16  ;;  %v933_v55 = vcombine.high %v923_v28, %v931_v48 }
 0x19a   : > { %v2278_v24 = vsel %vm2038_vm2, %v1487_v20, 0  ;;  %v882_v32 = vcombine.low %v873_v35, %v881_v22  ;;  %v1490_v37 = vpack.i.b16 %v1469_v31, %v1419_v5  ;;  %v1491_v7 = vshrl.u32 %v1419_v5, 16 }
 0x19b   : > { %v950_v38 = vshrl.u32 %v932_v4, 16  ;;  %v883_v52 = vcombine.high %v873_v35, %v881_v22  ;;  %v956_v42 = vshrl.u32 %v933_v55, 16 }
 0x19c   : > { %3786 = vmatmul.mubr.msk.bf16.vlgmr.msra.gmra.mxu1 %vm2038_vm2, %v942_v17  ;;  %v948_v40 = vpack.i.b16 %v932_v4, %v882_v32  ;;  %v949_v49 = vshrl.u32 %v882_v32, 16  ;;  %v1493_v2 = vpack.i.b16 %v1492_v21, %v1491_v7  ;;  %v2325_v3 = vsel %vm2038_vm2, %v1490_v37, 0 }
 0x19d   : > { %3796 = vmatpush3.bf16.xpose.msra.mxu1 %v2231_v0  ;;  %3797 = vmatprep.mubr.msk.bf16.mxu1 %vm3970_vm1, %v3969_v30  ;;  %v954_v43 = vpack.i.b16 %v933_v55, %v883_v52  ;;  %v955_v36 = vshrl.u32 %v883_v52, 16 }
 0x19e   : > { %3792 = vmatmul.mubr.msk.bf16.vlgmr.msra.gmra.mxu0 %vm2038_vm2, %v945_v1  ;;  %3807 = vmatprep.subr.bf16.mxu1 %v3969_v30  ;;  %v951_v25 = vpack.i.b16 %v950_v38, %v949_v49  ;;  %v2372_v58 = vsel %vm2038_vm2, %v1493_v2, 0  ;;  %v4463_v2 = vpop.permute.xlu1 %1498 }
 0x19f   : > { %3802 = vmatpush3.bf16.xpose.msra.mxu0 %v2278_v24  ;;  %3803 = vmatprep.mubr.msk.bf16.mxu0 %vm3970_vm1, %v3969_v30  ;;  %v957_v9 = vpack.i.b16 %v956_v42, %v955_v36 }
 0x1a0   : > { %3813 = vmatprep.subr.bf16.mxu0 %v3969_v30 }
 0x1a4   : > { %3798 = vmatmul.mubr.msk.bf16.vlgmr.msra.gmra.mxu1 %vm2038_vm2, %v948_v40 }
 0x1a5   : > { %3808 = vmatpush3.bf16.xpose.msra.mxu1 %v2325_v3  ;;  %3809 = vmatprep.mubr.msk.bf16.mxu1 %vm3970_vm1, %v3969_v30 }
 0x1a6   : > { %3804 = vmatmul.mubr.msk.bf16.vlgmr.msra.gmra.mxu0 %vm2038_vm2, %v951_v25  ;;  %3819 = vmatprep.subr.bf16.mxu1 %v3969_v30 }
 0x1a7   : > { %3814 = vmatpush3.bf16.xpose.msra.mxu0 %v2372_v58  ;;  %3815 = vmatprep.mubr.msk.bf16.mxu0 %vm3970_vm1, %v3969_v30 }
 0x1a8   : > { %3825 = vmatprep.subr.bf16.mxu0 %v3969_v30 }
 0x1ac   : > { %3810 = vmatmul.mubr.msk.bf16.vlgmr.msra.gmra.mxu1 %vm2038_vm2, %v954_v43 }
 0x1ad   : > { %3821 = vmatprep.mubr.msk.bf16.mxu1 %vm3970_vm1, %v3969_v30 }
 0x1ae   : > { %3816 = vmatmul.mubr.msk.bf16.vlgmr.msra.gmra.mxu0 %vm2038_vm2, %v957_v9 }
 0x1af   : > { %3827 = vmatprep.mubr.msk.bf16.mxu0 %vm3970_vm1, %v3969_v30 }
 0x254   : > { %v4391_v45 = vpop.f32.mrf.mxu1 }
 0x255   : > { %v2416_v46 = vsel %vm2415_vm3, %v4391_v45, -inf }
 0x256   : > { %v4395_v33 = vpop.f32.mrf.mxu0  ;;  %2417 = vmax.xlane.f32.xlu0 %v2416_v46  ;;  %v3775_v34 = vpop.f32.mrf.mxu1 }
 0x257   : > { %v2422_v50 = vsel %vm2415_vm3, %v4395_v33, -inf }
 0x258   : > { %v4397_v53 = vpop.f32.mrf.mxu1  ;;  %v3781_v12 = vpop.f32.mrf.mxu0 }
 0x259   : > { %v2419_v27 = vsel %vm2415_vm3, %v4397_v53, -inf }
 0x25a   : > { %v4403_v15 = vpop.f32.mrf.mxu0  ;;  %2423 = vmax.xlane.f32.xlu0 %v2422_v50  ;;  %2420 = vmax.xlane.f32.xlu1 %v2419_v27  ;;  %v3776_v54 = vpop.f32.mrf.mxu1 }
 0x25b   : > { %v2425_v61 = vsel %vm2415_vm3, %v4403_v15, -inf }
 0x25c   : > { %v3782_v59 = vpop.f32.mrf.mxu0  ;;  %v4405_v60 = vpop.f32.mrf.mxu1 }
 0x25d   : > { %v2428_v62 = vsel %vm2415_vm3, %v4405_v60, -inf }
 0x25e   : > { %v4411_v23 = vpop.f32.mrf.mxu0  ;;  %2426 = vmax.xlane.f32.xlu0 %v2425_v61  ;;  %2429 = vmax.xlane.f32.xlu1 %v2428_v62  ;;  %v3787_v6 = vpop.f32.mrf.mxu1 }
 0x25f   : > { %v2434_v63 = vsel %vm2415_vm3, %v4411_v23, -inf }
 0x260   : > { %v4413_v51 = vpop.f32.mrf.mxu1  ;;  %v3793_v13 = vpop.f32.mrf.mxu0 }
 0x261   : > { %v2431_v29 = vsel %vm2415_vm3, %v4413_v51, -inf }
 0x262   : > { %v4419_v10 = vpop.f32.mrf.mxu0  ;;  %2435 = vmax.xlane.f32.xlu1 %v2434_v63  ;;  %2432 = vmax.xlane.f32.xlu0 %v2431_v29  ;;  %v3788_v47 = vpop.f32.mrf.mxu1 }
 0x263   : > { %v2437_v14 = vsel %vm2415_vm3, %v4419_v10, -inf }
 0x264   : > { %v3794_v44 = vpop.f32.mrf.mxu0  ;;  %v4421_v26 = vpop.f32.mrf.mxu1 }
 0x265   : > { %v2440_v11 = vsel %vm2415_vm3, %v4421_v26, -inf }
 0x266   : > { %v4427_v16 = vpop.f32.mrf.mxu0  ;;  %2438 = vmax.xlane.f32.xlu0 %v2437_v14  ;;  %2441 = vmax.xlane.f32.xlu1 %v2440_v11  ;;  %v3799_v18 = vpop.f32.mrf.mxu1 }
 0x267   : > { %v2446_v19 = vsel %vm2415_vm3, %v4427_v16, -inf }
 0x268   : > { %v4429_v48 = vpop.f32.mrf.mxu1  ;;  %v3805_v17 = vpop.f32.mrf.mxu0 }
 0x269   : > { %v2443_v20 = vsel %vm2415_vm3, %v4429_v48, -inf }
 0x26a   : > { %v4435_v22 = vpop.f32.mrf.mxu0  ;;  %2447 = vmax.xlane.f32.xlu1 %v2446_v19  ;;  %2444 = vmax.xlane.f32.xlu0 %v2443_v20  ;;  %v3800_v28 = vpop.f32.mrf.mxu1 }
 0x26b   : > { %v2449_v0 = vsel %vm2415_vm3, %v4435_v22, -inf }
 0x26c   : > { %v3806_v31 = vpop.f32.mrf.mxu0  ;;  %v4437_v35 = vpop.f32.mrf.mxu1 }
 0x26d   : > { %v2452_v1 = vsel %vm2415_vm3, %v4437_v35, -inf }
 0x26e   : > { %v4443_v4 = vpop.f32.mrf.mxu0  ;;  %2450 = vmax.xlane.f32.xlu0 %v2449_v0  ;;  %2453 = vmax.xlane.f32.xlu1 %v2452_v1  ;;  %v3811_v5 = vpop.f32.mrf.mxu1 }
 0x26f   : > { %v2458_v21 = vsel %vm2415_vm3, %v4443_v4, -inf }
 0x270   : > { %v4445_v24 = vpop.f32.mrf.mxu1  ;;  %v3817_v32 = vpop.f32.mrf.mxu0 }
 0x271   : > { %v2455_v37 = vsel %vm2415_vm3, %v4445_v24, -inf }
 0x272   : > { %v4451_v38 = vpop.f32.mrf.mxu0  ;;  %2459 = vmax.xlane.f32.xlu1 %v2458_v21  ;;  %2456 = vmax.xlane.f32.xlu0 %v2455_v37  ;;  %v3812_v7 = vpop.f32.mrf.mxu1 }
 0x273   : > { %v2461_v49 = vsel %vm2415_vm3, %v4451_v38, -inf }
 0x274   : > { %v3818_v40 = vpop.f32.mrf.mxu0 }
 0x275   : > { %v1514_v40 = vshrl.u32 %v4079_v41, 16 }
 0x276   : > { %2462 = vmax.xlane.f32.xlu0 %v2461_v49 }
 0x283   : > { %1506 = vrot.lane.b32.xlu1 %v4079_v41, %s3966_s8 }
 0x287   : > { %1504 = vrot.lane.b32.xlu1 %v4077_v39, %s3968_s10 }
 0x28c   : > { %1502 = vrot.lane.b32.xlu0 %v4079_v41, %s3968_s10 }
 0x290   : > { %1500 = vrot.lane.b32.xlu0 %v4077_v39, %s3967_s9 }
 0x2df   : > { %v2418_v3 = vpop.xlane.xlu0 %2417 }
 0x2e0   : > { %v2464_v25 = vsub.f32 %v4391_v45, %v2418_v3 }
 0x2e2   : > { %v2480_v55 = vmul.f32 1.442695, %v2464_v25 }
 0x2e3   : > { %v2424_v58 = vpop.xlane.xlu0 %2423  ;;  %v2421_v52 = vpop.xlane.xlu1 %2420 }
 0x2e4   : > { %3894 = vpow2.f32 %v2480_v55  ;;  %v2466_v42 = vsub.f32 %v4395_v33, %v2424_v58  ;;  %v2465_v43 = vsub.f32 %v4397_v53, %v2421_v52 }
 0x2e6   : > { %v2484_v36 = vmul.f32 1.442695, %v2466_v42  ;;  %v2482_v9 = vmul.f32 1.442695, %v2465_v43 }
 0x2e7   : > { %v2427_v46 = vpop.xlane.xlu0 %2426  ;;  %v2430_v34 = vpop.xlane.xlu1 %2429 }
 0x2e8   : > { %3896 = vpow2.f32 %v2484_v36  ;;  %v2467_v12 = vsub.f32 %v4403_v15, %v2427_v46  ;;  %v2468_v50 = vsub.f32 %v4405_v60, %v2430_v34 }
 0x2e9   : > { %3898 = vpow2.f32 %v2482_v9 }
 0x2ea   : > { %v2486_v27 = vmul.f32 1.442695, %v2467_v12  ;;  %v2488_v45 = vmul.f32 1.442695, %v2468_v50 }
 0x2eb   : > { %v2436_v54 = vpop.xlane.xlu1 %2435  ;;  %v2433_v59 = vpop.xlane.xlu0 %2432 }
 0x2ec   : > { %3900 = vpow2.f32 %v2486_v27  ;;  %v2470_v61 = vsub.f32 %v4411_v23, %v2436_v54  ;;  %v2469_v33 = vsub.f32 %v4413_v51, %v2433_v59 }
 0x2ed   : > { %3902 = vpow2.f32 %v2488_v45 }
 0x2ee   : > { %v2492_v53 = vmul.f32 1.442695, %v2470_v61  ;;  %v2490_v62 = vmul.f32 1.442695, %v2469_v33 }
 0x2ef   : > { %v2439_v6 = vpop.xlane.xlu0 %2438  ;;  %v2442_v13 = vpop.xlane.xlu1 %2441 }
 0x2f0   : > { %3904 = vpow2.f32 %v2492_v53  ;;  %v2471_v15 = vsub.f32 %v4419_v10, %v2439_v6  ;;  %v2472_v60 = vsub.f32 %v4421_v26, %v2442_v13 }
 0x2f1   : > { %v4474_v63 = vpop.eup %3894  ;;  %3906 = vpow2.f32 %v2490_v62 }
 0x2f2   : > { %v2494_v29 = vmul.f32 1.442695, %v2471_v15  ;;  %v2512_v47 = vsel %vm2415_vm3, %v4474_v63, 0.0  ;;  %v2496_v23 = vmul.f32 1.442695, %v2472_v60 }
 0x2f3   : > { %v2448_v44 = vpop.xlane.xlu1 %2447  ;;  %v2445_v51 = vpop.xlane.xlu0 %2444  ;;  %2513 = vadd.xlane.f32.xlu1 %v2512_v47 }
 0x2f4   : > { %3908 = vpow2.f32 %v2494_v29  ;;  %v2474_v14 = vsub.f32 %v4427_v16, %v2448_v44  ;;  %v2473_v11 = vsub.f32 %v4429_v48, %v2445_v51 }
 0x2f5   : > { %v4480_v18 = vpop.eup %3896  ;;  %3910 = vpow2.f32 %v2496_v23 }
 0x2f6   : > { %v4482_v10 = vpop.eup %3898  ;;  %v2498_v26 = vmul.f32 1.442695, %v2473_v11  ;;  %v2518_v17 = vsel %vm2415_vm3, %v4480_v18, 0.0  ;;  %v2500_v19 = vmul.f32 1.442695, %v2474_v14 }
 0x2f7   : > { %v2451_v20 = vpop.xlane.xlu0 %2450  ;;  %2519 = vadd.xlane.f32.xlu1 %v2518_v17  ;;  %v2454_v28 = vpop.xlane.xlu1 %2453  ;;  %v2515_v31 = vsel %vm2415_vm3, %v4482_v10, 0.0 }
 0x2f8   : > { %2516 = vadd.xlane.f32.xlu0 %v2515_v31  ;;  %3912 = vpow2.f32 %v2498_v26  ;;  %v2475_v0 = vsub.f32 %v4435_v22, %v2451_v20  ;;  %v2476_v5 = vsub.f32 %v4437_v35, %v2454_v28  ;;  %v1515_v22 = vshrl.u32 %v4463_v2, 16 }
 0x2f9   : > { %v4488_v16 = vpop.eup %3900  ;;  %3914 = vpow2.f32 %v2500_v19  ;;  %v1512_v35 = vpack.i.b16 %v4463_v2, %v4079_v41 }
 0x2fa   : > { %v4490_v48 = vpop.eup %3902  ;;  %v2521_v1 = vsel %vm2415_vm3, %v4488_v16, 0.0  ;;  %v2502_v49 = vmul.f32 1.442695, %v2475_v0  ;;  %v2504_v25 = vmul.f32 1.442695, %v2476_v5  ;;  %v1516_v43 = vpack.i.b16 %v1515_v22, %v1514_v40 }
 0x2fb   : > { %v2524_v32 = vsel %vm2415_vm3, %v4490_v48, 0.0  ;;  %v2460_v21 = vpop.xlane.xlu1 %2459  ;;  %v4498_v37 = vpop.xlane.xlu0 %2456  ;;  %v1542_v34 = vcombine.high %v1512_v35, %v4083_v56  ;;  %v1549_v61 = vrot.slane %v1512_v35, %v4085_v57 }
 0x2fc   : > { %2525 = vadd.xlane.f32.xlu1 %v2524_v32  ;;  %2522 = vadd.xlane.f32.xlu0 %v2521_v1  ;;  %v2478_v55 = vsub.f32 %v4443_v4, %v2460_v21  ;;  %3916 = vpow2.f32 %v2502_v49  ;;  %v1615_v51 = vrot.slane %v1516_v43, %v4085_v57 }
 0x2fd   : > { %v4500_v7 = vpop.eup %3904  ;;  %3918 = vpow2.f32 %v2504_v25  ;;  %v1556_v6 = vrot.slane %v1542_v34, %v4085_v57 }
 0x2fe   : > { %v2530_v3 = vsel %vm2415_vm3, %v4500_v7, 0.0  ;;  %v4509_v52 = vpop.eup %3906  ;;  %v2508_v41 = vmul.f32 1.442695, %v2478_v55 }
 0x2ff   : > { %v2463_v58 = vpop.xlane.xlu0 %2462  ;;  %v1507_v36 = vpop.permute.xlu1 %1506  ;;  %v2527_v4 = vsel %vm2415_vm3, %v4509_v52, 0.0 }
 0x300   : > { %2531 = vadd.xlane.f32.xlu0 %v2530_v3  ;;  %v2479_v9 = vsub.f32 %v4451_v38, %v2463_v58  ;;  %v1523_v50 = vshrl.u32 %v1507_v36, 16  ;;  %v1608_v38 = vcombine.high %v1516_v43, %v4083_v56  ;;  %3920 = vpow2.f32 %v2508_v41 }
 0x301   : > { %v4511_v42 = vpop.eup %3908 }
 0x302   : > { %v2533_v46 = vsel %vm2415_vm3, %v4511_v42, 0.0  ;;  %v4519_v12 = vpop.eup %3910  ;;  %v2510_v54 = vmul.f32 1.442695, %v2479_v9  ;;  %v1622_v14 = vrot.slane %v1608_v38, %v4085_v57 }
 0x303   : > { %2534 = vadd.xlane.f32.xlu1 %v2533_v46  ;;  %v1503_v2 = vpop.permute.xlu0 %1502  ;;  %v2536_v15 = vsel %vm2415_vm3, %v4519_v12, 0.0 }
 0x304   : > { %2528 = vadd.xlane.f32.xlu0 %v2527_v4  ;;  %v1520_v27 = vpack.i.b16 %v1507_v36, %v1503_v2  ;;  %v1522_v45 = vshrl.u32 %v1503_v2, 16  ;;  %3922 = vpow2.f32 %v2510_v54 }
 0x305   : > { %v4522_v59 = vpop.eup %3912 }
 0x306   : > { %v1524_v33 = vpack.i.b16 %v1523_v50, %v1522_v45  ;;  %v1557_v53 = vcombine.high %v1520_v27, %v4083_v56  ;;  %v1564_v62 = vrot.slane %v1520_v27, %v4085_v57  ;;  %v2539_v13 = vsel %vm2415_vm3, %v4522_v59, 0.0  ;;  %v4532_v60 = vpop.eup %3914 }
 0x307   : > { %2540 = vadd.xlane.f32.xlu1 %v2539_v13  ;;  %v2542_v1 = vsel %vm2415_vm3, %v4532_v60, 0.0 }
 0x308   : > { %v1571_v29 = vrot.slane %v1557_v53, %v4085_v57  ;;  %v1572_v47 = vcombine.low %v1549_v61, %v1564_v62  ;;  %v1573_v23 = vcombine.high %v1549_v61, %v1564_v62  ;;  %v1623_v44 = vcombine.high %v1524_v33, %v4083_v56  ;;  %2537 = vadd.xlane.f32.xlu0 %v2536_v15 }
 0x309   : > { %v1630_v11 = vrot.slane %v1524_v33, %v4085_v57  ;;  %v4550_v36 = vpop.eup %3916 }
 0x30a   : > { %v1580_v26 = vrot.slane %v1572_v47, %v4093_v8  ;;  %v1587_v17 = vrot.slane %v1573_v23, %v4093_v8  ;;  %v1588_v19 = vcombine.low %v1556_v6, %v1571_v29  ;;  %v1589_v20 = vcombine.high %v1556_v6, %v1571_v29  ;;  %v4554_v4 = vpop.eup %3918 }
 0x30b   : > { %v1637_v28 = vrot.slane %v1623_v44, %v4085_v57  ;;  %v1638_v31 = vcombine.low %v1615_v51, %v1630_v11  ;;  %v1639_v0 = vcombine.high %v1615_v51, %v1630_v11  ;;  %v2545_v61 = vsel %vm2415_vm3, %v4550_v36, 0.0 }
 0x30c   : > { %v1596_v5 = vrot.slane %v1588_v19, %v4093_v8  ;;  %v1603_v32 = vrot.slane %v1589_v20, %v4093_v8  ;;  %v1806_v21 = vcombine.low %v1580_v26, %v1587_v17  ;;  %v3669_v40 = vcombine.high %v1580_v26, %v1587_v17  ;;  %2543 = vadd.xlane.f32.xlu0 %v2542_v1 }
 0x30d   : > { %v1646_v22 = vrot.slane %v1638_v31, %v4093_v8  ;;  %v1653_v49 = vrot.slane %v1639_v0, %v4093_v8  ;;  %v1654_v3 = vcombine.low %v1622_v14, %v1637_v28  ;;  %v1655_v35 = vcombine.high %v1622_v14, %v1637_v28  ;;  %2546 = vadd.xlane.f32.xlu1 %v2545_v61  ;;  %v4564_v62 = vpop.eup %3920 }
 0x30e   : > { %v1813_v25 = vrot.slane %v1806_v21, %v4085_v57  ;;  %v1821_v55 = vrot.slane %v3669_v40, %v4085_v57  ;;  %v1822_v58 = vcombine.low %v1596_v5, %v1603_v32  ;;  %v3670_v43 = vcombine.high %v1596_v5, %v1603_v32 }
 0x30f   : > { %v1662_v9 = vrot.slane %v1654_v3, %v4093_v8  ;;  %v1669_v46 = vrot.slane %v1655_v35, %v4093_v8  ;;  %v1856_v34 = vcombine.low %v1646_v22, %v1653_v49  ;;  %v3671_v41 = vcombine.high %v1646_v22, %v1653_v49 }
 0x310   : > { %v1829_v2 = vrot.slane %v1822_v58, %v4085_v57  ;;  %v1837_v50 = vrot.slane %v3670_v43, %v4085_v57  ;;  %v2548_v33 = vsel %vm2415_vm3, %v4554_v4, 0.0  ;;  %v1838_v53 = vcombine.low %v1813_v25, %v1821_v55  ;;  %v4588_v58 = vpop.permute.xlu1 %1504 }
 0x311   : > { %v1863_v27 = vrot.slane %v1856_v34, %v4085_v57  ;;  %v1871_v45 = vrot.slane %v3671_v41, %v4085_v57  ;;  %v1872_v38 = vcombine.low %v1662_v9, %v1669_v46  ;;  %v3672_v54 = vcombine.high %v1662_v9, %v1669_v46  ;;  %2549 = vadd.xlane.f32.xlu0 %v2548_v33  ;;  %v4568_v47 = vpop.eup %3922  ;;  %v1501_v9 = vpop.permute.xlu0 %1500 }
 0x312   : > { %v1846_v6 = vcombine.low %v1829_v2, %v1837_v50  ;;  %v1845_v23 = vrot.slane %v1838_v53, %v4093_v8  ;;  %v2554_v14 = vsel %vm2415_vm3, %v4564_v62, 0.0  ;;  %v2557_v31 = vsel %vm2415_vm3, %v4568_v47, 0.0 }
 0x313   : > { %v1879_v13 = vrot.slane %v1872_v38, %v4085_v57  ;;  %v1887_v15 = vrot.slane %v3672_v54, %v4085_v57  ;;  %v1888_v29 = vcombine.low %v1863_v27, %v1871_v45  ;;  %v2477_v3 = vsub.f32 %v4445_v24, %v4498_v37 }
 0x314   : > { %v1853_v44 = vrot.slane %v1846_v6, %v4093_v8 }
 0x315   : > { %v1896_v51 = vcombine.low %v1879_v13, %v1887_v15  ;;  %2555 = vadd.xlane.f32.xlu0 %v2554_v14  ;;  %v1895_v26 = vrot.slane %v1888_v29, %v4093_v8  ;;  %v2506_v35 = vmul.f32 1.442695, %v2477_v3 }
 0x316   : > { %v1854_v11 = vcombine.low %v1845_v23, %v1853_v44  ;;  %v1855_v19 = vcombine.high %v1845_v23, %v1853_v44 }
 0x317   : > { %v1903_v17 = vrot.slane %v1896_v51, %v4093_v8  ;;  %3924 = vpow2.f32 %v2506_v35  ;;  %v1531_v51 = vshrl.u32 %v1501_v9, 16 }
 0x318   : > { %v2010_v0 = vshrl.u32 %v1854_v11, 16  ;;  %v2018_v1 = vshrl.u32 %v1855_v19, 16 }
 0x319   : > { %v1904_v20 = vcombine.low %v1895_v26, %v1903_v17  ;;  %v1905_v28 = vcombine.high %v1895_v26, %v1903_v17  ;;  %2558 = vadd.xlane.f32.xlu0 %v2557_v31  ;;  %v1528_v26 = vpack.i.b16 %v1501_v9, %v4077_v39 }
 0x31b   : > { %v2008_v5 = vpack.i.b16 %v1904_v20, %v1854_v11  ;;  %v2011_v32 = vshrl.u32 %v1904_v20, 16  ;;  %v2016_v21 = vpack.i.b16 %v1905_v28, %v1855_v19  ;;  %v2019_v40 = vshrl.u32 %v1905_v28, 16 }
 0x31c   : > { %v1530_v11 = vshrl.u32 %v4077_v39, 16 }
 0x31d   : > { %3820 = vmatpush3.bf16.msra.mxu1 %v2008_v5  ;;  %v2012_v22 = vpack.i.b16 %v2011_v32, %v2010_v0  ;;  %v2020_v49 = vpack.i.b16 %v2019_v40, %v2018_v1  ;;  %v1674_v5 = vcombine.high %v1528_v26, %v4083_v56 }
 0x31e   : > { %3831 = vmatprep.subr.bf16.mxu1 %v3969_v30  ;;  %1508 = vrot.lane.b32.xlu1 %v4077_v39, %s3966_s8  ;;  %v1532_v0 = vpack.i.b16 %v1531_v51, %v1530_v11  ;;  %v1681_v39 = vrot.slane %v1528_v26, %v4085_v57 }
 0x31f   : > { %3826 = vmatpush3.bf16.msra.mxu0 %v2012_v22  ;;  %v1688_v3 = vrot.slane %v1674_v5, %v4085_v57 }
 0x320   : > { %3837 = vmatprep.subr.bf16.mxu0 %v3969_v30  ;;  %v1747_v9 = vrot.slane %v1532_v0, %v4085_v57 }
 0x324   : > { %v4584_v25 = vpop.eup %3924 }
 0x325   : > { %v2551_v55 = vsel %vm2415_vm3, %v4584_v25, 0.0 }
 0x342   : > { %2552 = vadd.xlane.f32.xlu1 %v2551_v55 }
 0x37c   : > { %v2514_v43 = vpop.xlane.xlu1 %2513 }
 0x37d   : > { %3926 = vrcp.f32 %v2514_v43 }
 0x380   : > { %v2520_v34 = vpop.xlane.xlu1 %2519 }
 0x381   : > { %v2517_v46 = vpop.xlane.xlu0 %2516 }
 0x382   : > { %3928 = vrcp.f32 %v2517_v46 }
 0x383   : > { %3930 = vrcp.f32 %v2520_v34 }
 0x385   : > { %v2523_v41 = vpop.xlane.xlu0 %2522  ;;  %v2526_v24 = vpop.xlane.xlu1 %2525 }
 0x386   : > { %3932 = vrcp.f32 %v2523_v41 }
 0x389   : > { %v2532_v37 = vpop.xlane.xlu0 %2531 }
 0x38a   : > { %3934 = vrcp.f32 %v2532_v37  ;;  %v3927_v50 = vpop.eup %3926 }
 0x38b   : > { %3936 = vrcp.f32 %v2526_v24  ;;  %v2576_v38 = vmul.f32 %v3927_v50, %v4474_v63 }
 0x38c   : > { %v2535_v2 = vpop.xlane.xlu1 %2534 }
 0x38d   : > { %3938 = vrcp.f32 %v2535_v2  ;;  %v2529_v27 = vpop.xlane.xlu0 %2528 }
 0x38e   : > { %3940 = vrcp.f32 %v2529_v27 }
 0x38f   : > { %v3929_v45 = vpop.eup %3928 }
 0x390   : > { %v2577_v54 = vmul.f32 %v3929_v45, %v4482_v10  ;;  %v3931_v61 = vpop.eup %3930  ;;  %v2541_v15 = vpop.xlane.xlu1 %2540 }
 0x391   : > { %v2578_v6 = vmul.f32 %v3931_v61, %v4480_v18  ;;  %v2538_v29 = vpop.xlane.xlu0 %2537  ;;  %3942 = vrcp.f32 %v2541_v15 }
 0x392   : > { %v2592_v33 = vpack.c.bf16 %v2577_v54, %v2576_v38  ;;  %3944 = vrcp.f32 %v2538_v29 }
 0x393   : > { %v3933_v53 = vpop.eup %3932 }
 0x394   : > { %3822 = vmatmul.mubr.msk.bf16.vlgmr.msra.gmra.mxu1 %vm2415_vm3, %v2592_v33  ;;  %v2579_v13 = vmul.f32 %v3933_v53, %v4488_v16 }
 0x395   : > { %3832 = vmatpush3.bf16.msra.mxu1 %v2016_v21  ;;  %3833 = vmatprep.mubr.msk.bf16.mxu1 %vm3970_vm1, %v3969_v30  ;;  %v2544_v19 = vpop.xlane.xlu0 %2543 }
 0x396   : > { %3843 = vmatprep.subr.bf16.mxu1 %v3969_v30  ;;  %v2593_v63 = vpack.c.bf16 %v2579_v13, %v2578_v6  ;;  %v2547_v17 = vpop.xlane.xlu1 %2546  ;;  %3946 = vrcp.f32 %v2544_v19 }
 0x397   : > { %v3935_v23 = vpop.eup %3934  ;;  %3948 = vrcp.f32 %v2547_v17 }
 0x398   : > { %v3937_v10 = vpop.eup %3936  ;;  %3828 = vmatmul.mubr.msk.bf16.vlgmr.msra.gmra.mxu0 %vm2415_vm3, %v2593_v63  ;;  %v2582_v16 = vmul.f32 %v3935_v23, %v4500_v7 }
 0x399   : > { %3838 = vmatpush3.bf16.msra.mxu0 %v2020_v49  ;;  %3839 = vmatprep.mubr.msk.bf16.mxu0 %vm3970_vm1, %v3969_v30  ;;  %v2580_v20 = vmul.f32 %v3937_v10, %v4490_v48  ;;  %v1740_v48 = vcombine.high %v1532_v0, %v4083_v56 }
 0x39a   : > { %v3939_v44 = vpop.eup %3938  ;;  %3849 = vmatprep.subr.bf16.mxu0 %v3969_v30  ;;  %v1509_v7 = vpop.permute.xlu1 %1508 }
 0x39b   : > { %v3941_v18 = vpop.eup %3940  ;;  %v2583_v14 = vmul.f32 %v3939_v44, %v4511_v42  ;;  %v1538_v42 = vshrl.u32 %v4588_v58, 16  ;;  %v1536_v32 = vpack.i.b16 %v1509_v7, %v4588_v58  ;;  %v1539_v21 = vshrl.u32 %v1509_v7, 16 }
 0x39c   : > { %v2581_v28 = vmul.f32 %v3941_v18, %v4509_v52  ;;  %v4617_v52 = vpop.xlane.xlu0 %2549  ;;  %v1754_v46 = vrot.slane %v1740_v48, %v4085_v57 }
 0x39d   : > { %v2595_v31 = vpack.c.bf16 %v2583_v14, %v2582_v16  ;;  %v1540_v40 = vpack.i.b16 %v1539_v21, %v1538_v42  ;;  %v1689_v22 = vcombine.high %v1536_v32, %v4083_v56  ;;  %v1696_v49 = vrot.slane %v1536_v32, %v4085_v57 }
 0x39e   : > { %v2594_v1 = vpack.c.bf16 %v2581_v28, %v2580_v20 }
 0x39f   : > { %v1703_v35 = vrot.slane %v1689_v22, %v4085_v57  ;;  %v1704_v55 = vcombine.low %v1681_v39, %v1696_v49  ;;  %v1705_v58 = vcombine.high %v1681_v39, %v1696_v49  ;;  %v1755_v43 = vcombine.high %v1540_v40, %v4083_v56 }
 0x3a0   : > { %3834 = vmatmul.mubr.msk.bf16.vlgmr.msra.gmra.mxu1 %vm2415_vm3, %v2594_v1  ;;  %3840 = vmatmul.mubr.msk.bf16.vlgmr.msra.gmra.mxu0 %vm2415_vm3, %v2595_v31  ;;  %v1762_v34 = vrot.slane %v1540_v40, %v4085_v57  ;;  %v2556_v38 = vpop.xlane.xlu0 %2555  ;;  %v3943_v1 = vpop.eup %3942 }
 0x3a1   : > { %3845 = vmatprep.mubr.msk.bf16.mxu1 %vm3970_vm1, %v3969_v30  ;;  %3851 = vmatprep.mubr.msk.bf16.mxu0 %vm3970_vm1, %v3969_v30  ;;  %v1712_v41 = vrot.slane %v1704_v55, %v4093_v8  ;;  %v1719_v24 = vrot.slane %v1705_v58, %v4093_v8  ;;  %v1720_v37 = vcombine.low %v1688_v3, %v1703_v35  ;;  %v3945_v32 = vpop.eup %3944 }
 0x3a2   : > { %v1721_v2 = vcombine.high %v1688_v3, %v1703_v35  ;;  %v1769_v50 = vrot.slane %v1755_v43, %v4085_v57  ;;  %v1770_v27 = vcombine.low %v1747_v9, %v1762_v34  ;;  %v1771_v45 = vcombine.high %v1747_v9, %v1762_v34 }
 0x3a3   : > { %v1728_v56 = vrot.slane %v1720_v37, %v4093_v8  ;;  %v1906_v61 = vcombine.low %v1712_v41, %v1719_v24  ;;  %v3673_v33 = vcombine.high %v1712_v41, %v1719_v24  ;;  %v3947_v40 = vpop.eup %3946  ;;  %v2584_v43 = vmul.f32 %v3945_v32, %v4519_v12 }
 0x3a4   : > { %v1735_v54 = vrot.slane %v1721_v2, %v4093_v8  ;;  %v1778_v53 = vrot.slane %v1770_v27, %v4093_v8  ;;  %v1785_v6 = vrot.slane %v1771_v45, %v4093_v8  ;;  %v1786_v13 = vcombine.low %v1754_v46, %v1769_v50  ;;  %v2559_v31 = vpop.xlane.xlu0 %2558  ;;  %v3949_v35 = vpop.eup %3948 }
 0x3a5   : > { %v1787_v15 = vcombine.high %v1754_v46, %v1769_v50  ;;  %v1913_v29 = vrot.slane %v1906_v61, %v4085_v57  ;;  %v1921_v63 = vrot.slane %v3673_v33, %v4085_v57  ;;  %3950 = vrcp.f32 %v2559_v31 }
 0x3a6   : > { %v1922_v23 = vcombine.low %v1728_v56, %v1735_v54  ;;  %v3674_v10 = vcombine.high %v1728_v56, %v1735_v54  ;;  %v1794_v44 = vrot.slane %v1786_v13, %v4093_v8  ;;  %v1956_v18 = vcombine.low %v1778_v53, %v1785_v6 }
 0x3a7   : > { %v1801_v51 = vrot.slane %v1787_v15, %v4093_v8  ;;  %v3675_v16 = vcombine.high %v1778_v53, %v1785_v6  ;;  %v1938_v26 = vcombine.low %v1913_v29, %v1921_v63  ;;  %3952 = vrcp.f32 %v2556_v38 }
 0x3a8   : > { %v1929_v14 = vrot.slane %v1922_v23, %v4085_v57  ;;  %v1937_v11 = vrot.slane %v3674_v10, %v4085_v57  ;;  %v1963_v17 = vrot.slane %v1956_v18, %v4085_v57  ;;  %v2585_v9 = vmul.f32 %v3943_v1, %v4522_v59 }
 0x3a9   : > { %v1971_v19 = vrot.slane %v3675_v16, %v4085_v57  ;;  %v1972_v20 = vcombine.low %v1794_v44, %v1801_v51  ;;  %v3676_v28 = vcombine.high %v1794_v44, %v1801_v51  ;;  %v1945_v39 = vrot.slane %v1938_v26, %v4093_v8 }
 0x3aa   : > { %v1946_v0 = vcombine.low %v1929_v14, %v1937_v11  ;;  %v2586_v37 = vmul.f32 %v3947_v40, %v4532_v60  ;;  %v2587_v2 = vmul.f32 %v3949_v35, %v4550_v36  ;;  %v2596_v45 = vpack.c.bf16 %v2585_v9, %v2584_v43 }
 0x3ab   : > { %v1979_v5 = vrot.slane %v1972_v20, %v4085_v57  ;;  %v1987_v7 = vrot.slane %v3676_v28, %v4085_v57  ;;  %v1988_v42 = vcombine.low %v1963_v17, %v1971_v19  ;;  %3954 = vrcp.f32 %v4617_v52 }
 0x3ac   : > { %v1953_v21 = vrot.slane %v1946_v0, %v4093_v8  ;;  %v2597_v12 = vpack.c.bf16 %v2587_v2, %v2586_v37 }
 0x3ad   : > { %v1996_v48 = vcombine.low %v1979_v5, %v1987_v7  ;;  %v1995_v49 = vrot.slane %v1988_v42, %v4093_v8 }
 0x3ae   : > { %v1954_v22 = vcombine.low %v1945_v39, %v1953_v21  ;;  %v1955_v24 = vcombine.high %v1945_v39, %v1953_v21 }
 0x3af   : > { %v2003_v3 = vrot.slane %v1996_v48, %v4093_v8 }
 0x3b0   : > { %v2026_v34 = vshrl.u32 %v1954_v22, 16  ;;  %v2034_v56 = vshrl.u32 %v1955_v24, 16 }
 0x3b1   : > { %v2004_v55 = vcombine.low %v1995_v49, %v2003_v3  ;;  %v2005_v58 = vcombine.high %v1995_v49, %v2003_v3 }
 0x3b2   : > { %v3951_v59 = vpop.eup %3950 }
 0x3b3   : > { %v2024_v46 = vpack.i.b16 %v2004_v55, %v1954_v22  ;;  %v2027_v41 = vshrl.u32 %v2004_v55, 16  ;;  %v2035_v27 = vshrl.u32 %v2005_v58, 16  ;;  %v2032_v38 = vpack.i.b16 %v2005_v58, %v1955_v24 }
 0x3b4   : > { %v3953_v60 = vpop.eup %3952  ;;  %v2591_v36 = vmul.f32 %v3951_v59, %v4568_v47 }
 0x3b5   : > { %3844 = vmatpush3.bf16.msra.mxu1 %v2024_v46  ;;  %v2028_v50 = vpack.i.b16 %v2027_v41, %v2026_v34  ;;  %v2036_v54 = vpack.i.b16 %v2035_v27, %v2034_v56  ;;  %v2590_v61 = vmul.f32 %v3953_v60, %v4564_v62 }
 0x3b6   : > { %3855 = vmatprep.subr.bf16.mxu1 %v3969_v30 }
 0x3b7   : > { %3850 = vmatpush3.bf16.msra.mxu0 %v2028_v50  ;;  %v2599_v33 = vpack.c.bf16 %v2591_v36, %v2590_v61 }
 0x3b8   : > { %3846 = vmatmul.mubr.msk.bf16.vlgmr.msra.gmra.mxu1 %vm2415_vm3, %v2596_v45  ;;  %3861 = vmatprep.subr.bf16.mxu0 %v3969_v30  ;;  %v3955_v6 = vpop.eup %3954 }
 0x3b9   : > { %3856 = vmatpush3.bf16.msra.mxu1 %v2032_v38  ;;  %3857 = vmatprep.mubr.msk.bf16.mxu1 %vm3970_vm1, %v3969_v30  ;;  %v2588_v15 = vmul.f32 %v3955_v6, %v4554_v4 }
 0x3ba   : > { %3852 = vmatmul.mubr.msk.bf16.vlgmr.msra.gmra.mxu0 %vm2415_vm3, %v2597_v12 }
 0x3bb   : > { %3862 = vmatpush3.bf16.msra.mxu0 %v2036_v54  ;;  %3863 = vmatprep.mubr.msk.bf16.mxu0 %vm3970_vm1, %v3969_v30 }
 0x3c2   : > { %3864 = vmatmul.mubr.msk.bf16.vlgmr.msra.gmra.mxu0 %vm2415_vm3, %v2599_v33 }
 0x3cb   : > { %v2553_v53 = vpop.xlane.xlu1 %2552 }
 0x3cc   : > { %3956 = vrcp.f32 %v2553_v53 }
 0x3d9   : > { %v3957_v13 = vpop.eup %3956 }
 0x3da   : > { %v2589_v29 = vmul.f32 %v3957_v13, %v4584_v25 }
 0x3dc   : > { %v2598_v63 = vpack.c.bf16 %v2589_v29, %v2588_v15 }
 0x3de   : > { %3858 = vmatmul.mubr.msk.bf16.vlgmr.msra.gmra.mxu1 %vm2415_vm3, %v2598_v63 }
 0x454   : > { %v2637_v30 = vpop.f32.mrf.mxu1 }
 0x456   : > { %v3823_v47 = vpop.f32.mrf.mxu1 }
 0x458   : > { %v2640_v23 = vpop.f32.mrf.mxu1  ;;  %v2681_v62 = vpop.f32.mrf.mxu0 }
 0x45a   : > { %v3824_v10 = vpop.f32.mrf.mxu1  ;;  %v3829_v44 = vpop.f32.mrf.mxu0 }
 0x45c   : > { %v2684_v51 = vpop.f32.mrf.mxu0 }
 0x45e   : > { %v3830_v18 = vpop.f32.mrf.mxu0 }
 0x460   : > { %v2725_v52 = vpop.f32.mrf.mxu1  ;;  %v2769_v11 = vpop.f32.mrf.mxu0 }
 0x461   : > { %v2952_v16 = vcombine.low %v2637_v30, %v2725_v52  ;;  %v2953_v14 = vcombine.high %v2637_v30, %v2725_v52  ;;  %v2968_v26 = vcombine.low %v2681_v62, %v2769_v11  ;;  %v2969_v17 = vcombine.high %v2681_v62, %v2769_v11 }
 0x462   : > { %v3835_v4 = vpop.f32.mrf.mxu1  ;;  %v3841_v20 = vpop.f32.mrf.mxu0 }
 0x463   : > { %v2960_v25 = vrot.slane %v2952_v16, %v4085_v57  ;;  %v2967_v19 = vrot.slane %v2953_v14, %v4085_v57  ;;  %v2976_v28 = vrot.slane %v2968_v26, %v4085_v57  ;;  %v2983_v31 = vrot.slane %v2969_v17, %v4085_v57 }
 0x464   : > { %v2728_v0 = vpop.f32.mrf.mxu1  ;;  %v2772_v7 = vpop.f32.mrf.mxu0 }
 0x465   : > { %v3020_v1 = vcombine.low %v2640_v23, %v2728_v0  ;;  %v3021_v5 = vcombine.high %v2640_v23, %v2728_v0  ;;  %v2984_v42 = vcombine.low %v2960_v25, %v2976_v28  ;;  %v2985_v32 = vcombine.high %v2960_v25, %v2976_v28 }
 0x466   : > { %v3000_v21 = vcombine.low %v2967_v19, %v2983_v31  ;;  %v3001_v39 = vcombine.high %v2967_v19, %v2983_v31  ;;  %v3836_v48 = vpop.f32.mrf.mxu1  ;;  %v3036_v49 = vcombine.low %v2684_v51, %v2772_v7  ;;  %v3037_v3 = vcombine.high %v2684_v51, %v2772_v7  ;;  %v3842_v35 = vpop.f32.mrf.mxu0 }
 0x467   : > { %v3028_v40 = vrot.slane %v3020_v1, %v4085_v57  ;;  %v3035_v22 = vrot.slane %v3021_v5, %v4085_v57  ;;  %v2992_v55 = vrot.slane %v2984_v42, %v4093_v8  ;;  %v2999_v58 = vrot.slane %v2985_v32, %v4093_v8 }
 0x468   : > { %v3008_v43 = vrot.slane %v3000_v21, %v4093_v8  ;;  %v3015_v9 = vrot.slane %v3001_v39, %v4093_v8  ;;  %v3044_v46 = vrot.slane %v3036_v49, %v4085_v57  ;;  %v3051_v34 = vrot.slane %v3037_v3, %v4085_v57 }
 0x469   : > { %v3224_v41 = vcombine.low %v2992_v55, %v2999_v58  ;;  %v3693_v24 = vcombine.high %v2992_v55, %v2999_v58 }
 0x46a   : > { %v3240_v37 = vcombine.low %v3008_v43, %v3015_v9  ;;  %v3694_v2 = vcombine.high %v3008_v43, %v3015_v9  ;;  %v3052_v50 = vcombine.low %v3028_v40, %v3044_v46  ;;  %v3053_v27 = vcombine.high %v3028_v40, %v3044_v46 }
 0x46b   : > { %v3068_v45 = vcombine.low %v3035_v22, %v3051_v34  ;;  %v3069_v38 = vcombine.high %v3035_v22, %v3051_v34  ;;  %v3231_v56 = vrot.slane %v3224_v41, %v4085_v57  ;;  %v3239_v12 = vrot.slane %v3693_v24, %v4085_v57 }
 0x46c   : > { %v3247_v59 = vrot.slane %v3240_v37, %v4085_v57  ;;  %v3255_v54 = vrot.slane %v3694_v2, %v4085_v57  ;;  %v3060_v60 = vrot.slane %v3052_v50, %v4093_v8  ;;  %v3067_v36 = vrot.slane %v3053_v27, %v4093_v8 }
 0x46d   : > { %v3076_v61 = vrot.slane %v3068_v45, %v4093_v8  ;;  %v3083_v33 = vrot.slane %v3069_v38, %v4093_v8  ;;  %v3257_v53 = vcombine.high %v3231_v56, %v3239_v12  ;;  %v3256_v13 = vcombine.low %v3231_v56, %v3239_v12 }
 0x46e   : > { %v3273_v6 = vcombine.high %v3247_v59, %v3255_v54  ;;  %v3272_v15 = vcombine.low %v3247_v59, %v3255_v54  ;;  %v3292_v29 = vcombine.low %v3060_v60, %v3067_v36  ;;  %v3695_v63 = vcombine.high %v3060_v60, %v3067_v36 }
 0x46f   : > { %v3308_v30 = vcombine.low %v3076_v61, %v3083_v33  ;;  %v3696_v47 = vcombine.high %v3076_v61, %v3083_v33  ;;  %v3271_v23 = vrot.slane %v3257_v53, %v4093_v8  ;;  %v4692_v10 = vrot.slane %v3256_v13, %v4093_v8 }
 0x470   : > { %v3287_v62 = vrot.slane %v3273_v6, %v4093_v8  ;;  %v4695_v44 = vrot.slane %v3272_v15, %v4093_v8  ;;  %v3299_v51 = vrot.slane %v3292_v29, %v4085_v57  ;;  %v3307_v18 = vrot.slane %v3695_v63, %v4085_v57 }
 0x471   : > { %v3315_v52 = vrot.slane %v3308_v30, %v4085_v57  ;;  %v3323_v16 = vrot.slane %v3696_v47, %v4085_v57 }
 0x472   : > { %v3290_v14 = vcombine.low %v3271_v23, %v3287_v62  ;;  %v3289_v11 = vcombine.high %v4692_v10, %v4695_v44  ;;  %v3288_v26 = vcombine.low %v4692_v10, %v4695_v44  ;;  %v3325_v17 = vcombine.high %v3299_v51, %v3307_v18 }
 0x473   : > { %v3341_v4 = vcombine.high %v3315_v52, %v3323_v16  ;;  %v3324_v25 = vcombine.low %v3299_v51, %v3307_v18  ;;  %v3340_v19 = vcombine.low %v3315_v52, %v3323_v16  ;;  %v3291_v1 = vcombine.high %v3271_v23, %v3287_v62 }
 0x474   : > { %3516 = vrot.lane.b32.xlu0 %v3290_v14, %s3974_s14  ;;  %3500 = vrot.lane.b32.xlu1 %v3289_v11, %s3975_s15  ;;  %v3339_v20 = vrot.slane %v3325_v17, %v4093_v8 }
 0x475   : > { %v3355_v28 = vrot.slane %v3341_v4, %v4093_v8  ;;  %v4710_v31 = vrot.slane %v3324_v25, %v4093_v8  ;;  %v4713_v0 = vrot.slane %v3340_v19, %v4093_v8 }
 0x477   : > { %v3358_v5 = vcombine.low %v3339_v20, %v3355_v28  ;;  %v3356_v7 = vcombine.low %v4710_v31, %v4713_v0  ;;  %v3357_v42 = vcombine.high %v4710_v31, %v4713_v0  ;;  %v3359_v32 = vcombine.high %v3339_v20, %v3355_v28 }
 0x478   : > { %3532 = vrot.lane.b32.xlu0 %v3291_v1, %s3976_s17  ;;  %v2813_v21 = vpop.f32.mrf.mxu1 }
 0x479   : > { %3518 = vrot.lane.b32.xlu1 %v3358_v5, %s3974_s14 }
 0x47a   : > { %v2857_v39 = vpop.f32.mrf.mxu0  ;;  %v3847_v48 = vpop.f32.mrf.mxu1 }
 0x47c   : > { %3502 = vrot.lane.b32.xlu0 %v3357_v42, %s3975_s15  ;;  %v2816_v40 = vpop.f32.mrf.mxu1  ;;  %v3853_v22 = vpop.f32.mrf.mxu0 }
 0x47d   : > { %3534 = vrot.lane.b32.xlu1 %v3359_v32, %s3976_s17 }
 0x47e   : > { %v2860_v49 = vpop.f32.mrf.mxu0  ;;  %v3848_v3 = vpop.f32.mrf.mxu1 }
 0x480   : > { %v3854_v35 = vpop.f32.mrf.mxu0 }
 0x482   : > { %v2945_v55 = vpop.f32.mrf.mxu0 }
 0x483   : > { %v3104_v46 = vcombine.low %v2857_v39, %v2945_v55  ;;  %v3105_v34 = vcombine.high %v2857_v39, %v2945_v55 }
 0x484   : > { %v3865_v58 = vpop.f32.mrf.mxu0 }
 0x485   : > { %v3112_v50 = vrot.slane %v3104_v46, %v4085_v57  ;;  %v3119_v27 = vrot.slane %v3105_v34, %v4085_v57 }
 0x486   : > { %v2948_v43 = vpop.f32.mrf.mxu0 }
 0x487   : > { %v3172_v56 = vcombine.low %v2860_v49, %v2948_v43  ;;  %v3173_v12 = vcombine.high %v2860_v49, %v2948_v43 }
 0x488   : > { %v3866_v9 = vpop.f32.mrf.mxu0 }
 0x489   : > { %v3180_v30 = vrot.slane %v3172_v56, %v4085_v57  ;;  %v3187_v47 = vrot.slane %v3173_v12, %v4085_v57 }
 0x49e   : > { %v2901_v41 = vpop.f32.mrf.mxu1 }
 0x49f   : > { %v3088_v24 = vcombine.low %v2813_v21, %v2901_v41  ;;  %v3089_v37 = vcombine.high %v2813_v21, %v2901_v41 }
 0x4a0   : > { %v3859_v2 = vpop.f32.mrf.mxu1 }
 0x4a1   : > { %v3096_v45 = vrot.slane %v3088_v24, %v4085_v57  ;;  %v3103_v38 = vrot.slane %v3089_v37, %v4085_v57 }
 0x4a2   : > { %v2904_v59 = vpop.f32.mrf.mxu1 }
 0x4a3   : > { %v3120_v54 = vcombine.low %v3096_v45, %v3112_v50  ;;  %v3121_v60 = vcombine.high %v3096_v45, %v3112_v50  ;;  %v3136_v36 = vcombine.low %v3103_v38, %v3119_v27  ;;  %v3137_v61 = vcombine.high %v3103_v38, %v3119_v27 }
 0x4a4   : > { %v3156_v33 = vcombine.low %v2816_v40, %v2904_v59  ;;  %v3157_v53 = vcombine.high %v2816_v40, %v2904_v59  ;;  %v3860_v6 = vpop.f32.mrf.mxu1 }
 0x4a5   : > { %v3128_v13 = vrot.slane %v3120_v54, %v4093_v8  ;;  %v3135_v15 = vrot.slane %v3121_v60, %v4093_v8  ;;  %v3144_v29 = vrot.slane %v3136_v36, %v4093_v8  ;;  %v3151_v63 = vrot.slane %v3137_v61, %v4093_v8 }
 0x4a6   : > { %v3164_v23 = vrot.slane %v3156_v33, %v4085_v57  ;;  %v3171_v62 = vrot.slane %v3157_v53, %v4085_v57 }
 0x4a7   : > { %v3360_v51 = vcombine.low %v3128_v13, %v3135_v15  ;;  %v3697_v18 = vcombine.high %v3128_v13, %v3135_v15  ;;  %v3376_v52 = vcombine.low %v3144_v29, %v3151_v63  ;;  %v3698_v16 = vcombine.high %v3144_v29, %v3151_v63 }
 0x4a8   : > { %v3188_v14 = vcombine.low %v3164_v23, %v3180_v30  ;;  %v3189_v11 = vcombine.high %v3164_v23, %v3180_v30  ;;  %v3204_v17 = vcombine.low %v3171_v62, %v3187_v47  ;;  %v3205_v4 = vcombine.high %v3171_v62, %v3187_v47 }
 0x4a9   : > { %v3367_v25 = vrot.slane %v3360_v51, %v4085_v57  ;;  %v3375_v19 = vrot.slane %v3697_v18, %v4085_v57  ;;  %v3383_v20 = vrot.slane %v3376_v52, %v4085_v57  ;;  %v3391_v28 = vrot.slane %v3698_v16, %v4085_v57 }
 0x4aa   : > { %v3196_v1 = vrot.slane %v3188_v14, %v4093_v8  ;;  %v3203_v5 = vrot.slane %v3189_v11, %v4093_v8  ;;  %v3212_v42 = vrot.slane %v3204_v17, %v4093_v8  ;;  %v3219_v32 = vrot.slane %v3205_v4, %v4093_v8 }
 0x4ab   : > { %v3393_v21 = vcombine.high %v3367_v25, %v3375_v19  ;;  %v3409_v39 = vcombine.high %v3383_v20, %v3391_v28  ;;  %v3392_v48 = vcombine.low %v3367_v25, %v3375_v19  ;;  %v3408_v40 = vcombine.low %v3383_v20, %v3391_v28 }
 0x4ac   : > { %v3428_v22 = vcombine.low %v3196_v1, %v3203_v5  ;;  %v3699_v49 = vcombine.high %v3196_v1, %v3203_v5  ;;  %v3444_v3 = vcombine.low %v3212_v42, %v3219_v32  ;;  %v3700_v35 = vcombine.high %v3212_v42, %v3219_v32 }
 0x4ad   : > { %v3407_v55 = vrot.slane %v3393_v21, %v4093_v8  ;;  %v3423_v58 = vrot.slane %v3409_v39, %v4093_v8  ;;  %v3400_v43 = vrot.slane %v3392_v48, %v4093_v8  ;;  %v3416_v9 = vrot.slane %v3408_v40, %v4093_v8 }
 0x4ae   : > { %v3435_v46 = vrot.slane %v3428_v22, %v4085_v57  ;;  %v3443_v34 = vrot.slane %v3699_v49, %v4085_v57  ;;  %v3451_v41 = vrot.slane %v3444_v3, %v4085_v57  ;;  %v3459_v24 = vrot.slane %v3700_v35, %v4085_v57 }
 0x4af   : > { %v3426_v37 = vcombine.low %v3407_v55, %v3423_v58  ;;  %v3425_v2 = vcombine.high %v3400_v43, %v3416_v9  ;;  %v3424_v50 = vcombine.low %v3400_v43, %v3416_v9  ;;  %v3427_v54 = vcombine.high %v3407_v55, %v3423_v58 }
 0x4b0   : > { %v3460_v27 = vcombine.low %v3435_v46, %v3443_v34  ;;  %v3476_v45 = vcombine.low %v3451_v41, %v3459_v24  ;;  %v3461_v38 = vcombine.high %v3435_v46, %v3443_v34  ;;  %v3477_v56 = vcombine.high %v3451_v41, %v3459_v24 }
 0x4b1   : > { %3520 = vrot.lane.b32.xlu0 %v3426_v37, %s3974_s14  ;;  %3504 = vrot.lane.b32.xlu1 %v3425_v2, %s3975_s15 }
 0x4b2   : > { %v3468_v12 = vrot.slane %v3460_v27, %v4093_v8  ;;  %v3484_v59 = vrot.slane %v3476_v45, %v4093_v8  ;;  %v3475_v57 = vrot.slane %v3461_v38, %v4093_v8  ;;  %v3491_v36 = vrot.slane %v3477_v56, %v4093_v8 }
 0x4b4   : > { %v3493_v60 = vcombine.high %v3468_v12, %v3484_v59  ;;  %v3492_v61 = vcombine.low %v3468_v12, %v3484_v59  ;;  %v3494_v33 = vcombine.low %v3475_v57, %v3491_v36  ;;  %v3495_v53 = vcombine.high %v3475_v57, %v3491_v36 }
 0x4b5   : > { %3536 = vrot.lane.b32.xlu0 %v3427_v54, %s3976_s17 }
 0x4b6   : > { %3506 = vrot.lane.b32.xlu1 %v3493_v60, %s3975_s15 }
 0x4ba   : > { %3522 = vrot.lane.b32.xlu1 %v3494_v33, %s3974_s14 }
 0x4be   : > { %3538 = vrot.lane.b32.xlu1 %v3495_v53, %s3976_s17 }
 0x4e6   : > { %v3517_v6 = vpop.permute.xlu0 %3516  ;;  %v3501_v13 = vpop.permute.xlu1 %3500 }
 0x4e7   : > { %v3544_v15 = vsel %vm2038_vm2, %v3288_v26, %v3501_v13 }
 0x4e8   : > { %v3548_v29 = vsel %vm2415_vm3, %v3544_v15, %v3517_v6 }
 0x4ea   : > { %v3533_v8 = vpop.permute.xlu0 %3532 }
 0x4eb   : > { %v3553_v63 = vsel %vm3552_vm4, %v3548_v29, %v3533_v8  ;;  %v3519_v30 = vpop.permute.xlu1 %3518 }
 0x4ec   : > { %3557 = vst.msk [vmem:[%s172_s21] sm:$0xff] %vm212_vm0, %v3553_v63 }
 0x4ee   : > { %v3503_v47 = vpop.permute.xlu0 %3502 }
 0x4ef   : > { %v3545_v10 = vsel %vm2038_vm2, %v3356_v7, %v3503_v47  ;;  %v3535_v44 = vpop.permute.xlu1 %3534 }
 0x4f0   : > { %v3549_v26 = vsel %vm2415_vm3, %v3545_v10, %v3519_v30 }
 0x4f1   : > { %v3554_v23 = vsel %vm3552_vm4, %v3549_v26, %v3535_v44 }
 0x4f2   : > { %3558 = vst.msk [vmem:[%s172_s21 + $0x8] sm:$0xff] %vm212_vm0, %v3554_v23 }
 0x523   : > { %v3521_v62 = vpop.permute.xlu0 %3520  ;;  %v3505_v51 = vpop.permute.xlu1 %3504 }
 0x524   : > { %v3546_v18 = vsel %vm2038_vm2, %v3424_v50, %v3505_v51 }
 0x525   : > { %v3550_v16 = vsel %vm2415_vm3, %v3546_v18, %v3521_v62 }
 0x527   : > { %v3537_v52 = vpop.permute.xlu0 %3536 }
 0x528   : > { %v3555_v14 = vsel %vm3552_vm4, %v3550_v16, %v3537_v52  ;;  %v3507_v11 = vpop.permute.xlu1 %3506 }
 0x529   : > { %3559 = vst.msk [vmem:[%s172_s21 + $0x10] sm:$0xff] %vm212_vm0, %v3555_v14  ;;  %v3547_v0 = vsel %vm2038_vm2, %v3492_v61, %v3507_v11 }
 0x52c   : > { %v3523_v31 = vpop.permute.xlu1 %3522 }
 0x52d   : > { %v3551_v7 = vsel %vm2415_vm3, %v3547_v0, %v3523_v31 }
 0x530   : > { %v3539_v17 = vpop.permute.xlu1 %3538 }
 0x531   : > { %v3556_v4 = vsel %vm3552_vm4, %v3551_v7, %v3539_v17 }
 0x532   : > { %3560 = vst.msk [vmem:[%s172_s21 + $0x18] sm:$0xff] %vm212_vm0, %v3556_v4 }
 0x533 PF: > { %s13_s12 = sadd.s32 1, %s3964_s12  }
 0x534   : > { %p10_p4 = scmp.ge.s32.totalorder %s13_s12, 6  }
 0x536   :  { %12 = sbr.rel (!%p10_p4) target bundleno = 1 (0x1), region = 66 }

</bundles_post_ra>
